<compile_context>
chip_gen: v7x
topology: tpu7x:2x2x1
jax: 0.10.0
libtpu: 0.0.40
codegen_flags: <defaults>
</compile_context>

<pallas_src>
import numpy as np
import jax
import jax.numpy as jnp
from jax.experimental import pallas as pl
from jax.experimental.pallas import tpu as pltpu

IMG_EMBEDDING_DIM = 100  # torch.rand(1, 100) inside forward() pins this
_H1_PAD = 8              # stage-1 activation rows (4) padded to one 8-sublane tile
_H2_PAD = 16             # stage-2 activation rows (12) padded to a multiple of 8


# ----------------------------------------------------------------------------
# Parameter setup (host glue): deterministic init + packing for the kernel
# ----------------------------------------------------------------------------
def _uniform(rng, shape, fan_in):
    bound = 1.0 / np.sqrt(fan_in)
    return rng.uniform(-bound, bound, size=shape).astype(np.float32)


def _deconv_pack(weight, bias, h_in, w_in, stride=2, lane_pad=128,
                 h_in_pad=None, h_out_pad=None):
    """Pack ConvTranspose2d (PyTorch layout (C_in, C_out, K, K), padding=0) for the
    (H, W*C)-activation-layout kernel (exact re-indexing of the linear map):

      m_all : (W_in*C_in, K*blk)      hstacked per-kh width/channel matrices; block kh
                                      lives in columns [kh*blk, kh*blk + W_out*C_out),
                                      blk = W_out*C_out rounded up to a 128-lane
                                      multiple so in-kernel block slices stay aligned.
      s_cat : (h_out_pad, K*h_in_pad) combined 0/1 height scatter (overlap-add):
                                      column kh*h_in_pad + ih -> row stride*ih + kh,
                                      zero columns for padded ih rows.
      b_row : (1, W_out*C_out)        bias broadcast row (b[co] at column ow*C_out+co).
    """
    c_in, c_out, k, _ = weight.shape
    h_out = (h_in - 1) * stride + k
    w_out = (w_in - 1) * stride + k
    h_in_pad = h_in if h_in_pad is None else h_in_pad
    h_out_pad = h_out if h_out_pad is None else h_out_pad
    wc_out = w_out * c_out
    blk = -(-wc_out // lane_pad) * lane_pad
    m_all = np.zeros((w_in * c_in, k * blk), dtype=np.float32)
    for kh in range(k):
        for iw in range(w_in):
            for kw in range(k):
                ow = stride * iw + kw
                col = kh * blk + ow * c_out
                m_all[iw * c_in:(iw + 1) * c_in, col:col + c_out] = weight[:, :, kh, kw]
    s_cat = np.zeros((h_out_pad, k * h_in_pad), dtype=np.float32)
    for kh in range(k):
        for ih in range(h_in):
            s_cat[stride * ih + kh, kh * h_in_pad + ih] = 1.0
    b_row = np.tile(bias.astype(np.float32), w_out)[None, :]
    info = dict(k=k, h_out=h_out, w_out=w_out, wc_out=wc_out, blk=blk)
    return m_all, s_cat, b_row, info


def make_params():
    rng = np.random.RandomState(0)
    # img_change_dim: Linear(100, 64)   (torch layout: (out, in))
    wc = _uniform(rng, (64, IMG_EMBEDDING_DIM), IMG_EMBEDDING_DIM)
    bc = _uniform(rng, (64,), IMG_EMBEDDING_DIM)
    # img_decoder: ConvTranspose2d(64,32,4,2) / (32,16,6,2) / (16,1,6,2)
    w_d1 = _uniform(rng, (64, 32, 4, 4), 64 * 4 * 4)
    b_d1 = _uniform(rng, (32,), 64 * 4 * 4)
    w_d2 = _uniform(rng, (32, 16, 6, 6), 32 * 6 * 6)
    b_d2 = _uniform(rng, (16,), 32 * 6 * 6)
    w_d3 = _uniform(rng, (16, 1, 6, 6), 16 * 6 * 6)
    b_d3 = _uniform(rng, (1,), 16 * 6 * 6)
    # TODO(synk): img_encoder / img_lin11 / img_lin12 / reparameterize are dead code in
    # forward(); they are not materialized.

    m1, s1, b1, d1 = _deconv_pack(w_d1, b_d1, 1, 1)                      # 1x1  -> 4x4
    m2, s2, b2, d2 = _deconv_pack(w_d2, b_d2, d1["h_out"], d1["w_out"],  # 4x4  -> 12x12
                                  h_in_pad=_H1_PAD, h_out_pad=_H2_PAD)
    m3, s3, b3, d3 = _deconv_pack(w_d3, b_d3, d2["h_out"], d2["w_out"],  # 12x12-> 28x28
                                  h_in_pad=_H2_PAD)

    # Fuse img_change_dim into deconv1's packed width matrix:
    #   stage-1 row kh = z @ (Wc^T @ M1[kh]) + (bc @ M1[kh] + b1_row)
    # Valid because deconv1's input is 1x1 (its height scatter s1 is the identity) and
    # its per-kh block width (4*32 = 128) is already lane-aligned (blk == wc_out).
    assert d1["blk"] == d1["wc_out"] == 128 and np.allclose(s1, np.eye(d1["h_out"]))
    assert d1["h_out"] <= _H1_PAD and d2["h_out"] <= _H2_PAD
    wf = wc.T.astype(np.float64) @ m1.astype(np.float64)                 # (100, 4*128)
    bf = (bc[None, :].astype(np.float64) @ m1.astype(np.float64)
          + np.tile(b1, (1, d1["k"])))                                   # (1, 4*128)

    bf16 = jnp.bfloat16
    raw = dict(wc=wc, bc=bc, w_d1=w_d1, b_d1=b_d1, w_d2=w_d2, b_d2=b_d2,
               w_d3=w_d3, b_d3=b_d3)
    packed = dict(
        # bf16 MXU weights (f32 accumulate); biases / 0-1 scatter matrices stay f32.
        wf=jnp.asarray(wf, dtype=bf16), bf=jnp.asarray(bf, dtype=jnp.float32),
        m2=jnp.asarray(m2, dtype=bf16), s2=jnp.asarray(s2), b2=jnp.asarray(b2),
        m3=jnp.asarray(m3, dtype=bf16), s3=jnp.asarray(s3), b3=jnp.asarray(b3),
        dims=dict(h1=d1["h_out"], h1_pad=_H1_PAD, wc1=d1["blk"],
                  k2=d2["k"], blk2=d2["blk"], wc2=d2["wc_out"],
                  k3=d3["k"], blk3=d3["blk"], wc3=d3["wc_out"],
                  h_out=d3["h_out"], w_out=d3["w_out"]),
    )
    return raw, packed


# ----------------------------------------------------------------------------
# Pallas kernel: fused Linear+deconv1, then 2 factorised deconvs, ReLU/Sigmoid
# ----------------------------------------------------------------------------
def _make_decoder_kernel(dims):
    h1, h1p, wc1 = dims["h1"], dims["h1_pad"], dims["wc1"]
    k2, blk2, wc2 = dims["k2"], dims["blk2"], dims["wc2"]
    k3, blk3, wc3 = dims["k3"], dims["blk3"], dims["wc3"]
    f32, bf16 = jnp.float32, jnp.bfloat16

    def kernel(z_ref, wf_ref, bf_ref, m2_ref, s2_ref, b2_ref,
               m3_ref, s3_ref, b3_ref, out_ref):
        # ---- fused img_change_dim (Linear 100->64) + ConvT1 (1x1->4x4, 64->32) ----
        t1 = jnp.dot(z_ref[...].astype(bf16), wf_ref[...],
                     preferred_element_type=f32) + bf_ref[...]            # (1, 4*128)
        a1f = jnp.maximum(t1, 0.0)                                        # ReLU
        # Lane block kh -> sublane row kh (rows h1..h1p-1 stay zero).  Pure VPU
        # iota/select in registers: no scratch store/load, no reshape, no concat.
        row = jax.lax.broadcasted_iota(jnp.int32, (h1p, wc1), 0)
        a1 = jnp.zeros((h1p, wc1), f32)
        for i in range(h1):
            a1 = jnp.where(row == i, a1f[:, i * wc1:(i + 1) * wc1], a1)   # (8, 128)

        def deconv(a, m_ref, s_ref, b_ref, k, blk, wc):
            # ConvTranspose2d(stride=2, pad=0) on (H, W*C)-laid-out activations:
            #   one dot does channel contraction + width scatter for all kh at once
            #   (hstacked, 128-lane-aligned kh blocks), then one 0/1 matmul does the
            #   height scatter / overlap-add.  T stays f32 (no extra bf16 rounding);
            #   padded activation rows are dropped by zero columns of s_ref.
            t = jnp.dot(a.astype(bf16), m_ref[...],
                        preferred_element_type=f32)                       # (Hp, k*blk)
            ts = jnp.concatenate(
                [t[:, i * blk:(i + 1) * blk] for i in range(k)], axis=0)  # (k*Hp, blk)
            o = jnp.dot(s_ref[...], ts, preferred_element_type=f32)       # (Hout_p, blk)
            return o[:, :wc] + b_ref[...]

        a2 = jnp.maximum(deconv(a1, m2_ref, s2_ref, b2_ref, k2, blk2, wc2), 0.0)
        y3 = deconv(a2, m3_ref, s3_ref, b3_ref, k3, blk3, wc3)            # (28, 28)

        # Sigmoid: exp on the EUP + approx reciprocal (EUP rcp slot, err ~2^-12).
        out_ref[...] = pl.reciprocal(1.0 + jnp.exp(-y3), approx=True)

    return kernel


def decode_latents(z, packed):
    """Decode a batch of latents with one pallas_call.

    z: (B, 100) f32 -> (B, 1, 28, 28) f32.  The grid iterates over B; every weight
    BlockSpec returns block (0, 0) at each step so weights are DMA'd once and stay
    VMEM-resident across the whole batch, and the B axis is marked "parallel" so it
    can shard across v7x's two TensorCores."""
    dims = packed["dims"]
    b_total = z.shape[0]
    h_out, w_out = dims["h_out"], dims["w_out"]
    z3 = z.reshape(b_total, 1, IMG_EMBEDDING_DIM)

    def resident(arr):
        return pl.BlockSpec(arr.shape, lambda b: (0, 0))

    return pl.pallas_call(
        _make_decoder_kernel(dims),
        out_shape=jax.ShapeDtypeStruct((b_total, 1, h_out, w_out), jnp.float32),
        grid=(b_total,),
        in_specs=[
            pl.BlockSpec((None, 1, IMG_EMBEDDING_DIM), lambda b: (b, 0, 0)),
            resident(packed["wf"]), resident(packed["bf"]),
            resident(packed["m2"]), resident(packed["s2"]), resident(packed["b2"]),
            resident(packed["m3"]), resident(packed["s3"]), resident(packed["b3"]),
        ],
        # TODO(synk): for large B a lane-dense (B, 784) output (flattened in-kernel)
        # would avoid 28-lane masked stores; at the module's pinned B == 1 it is noise.
        out_specs=pl.BlockSpec((None, None, h_out, w_out), lambda b: (b, 0, 0, 0)),
        compiler_params=pltpu.CompilerParams(
            dimension_semantics=("parallel",),
            vmem_limit_bytes=16 * 1024 * 1024),
    )(z3, packed["wf"], packed["bf"],
      packed["m2"], packed["s2"], packed["b2"],
      packed["m3"], packed["s3"], packed["b3"])


def autoencoder_forward(x, key, packed):
    """Mirror of Autoencoder.forward(x): z ~ U[0,1)^(1,100) (torch.rand) is sampled
    here, decoded through img_change_dim + img_decoder (the Pallas kernel), and
    (x_d, z) is returned.  forward() only consumes x.size(0); its
    .view(x.size(0), 64, 1, 1) on a (1, 64) tensor pins the batch to 1."""
    assert x.shape[0] == 1, "forward()'s .view(x.size(0), 64, 1, 1) requires batch == 1"
    z = jax.random.uniform(key, (1, IMG_EMBEDDING_DIM), dtype=jnp.float32)
    x_d = decode_latents(z, packed)                                       # (1,1,28,28)
    return x_d, z


# ----------------------------------------------------------------------------
# Independent NumPy reference (direct conv-transpose loops, fp32)
# ----------------------------------------------------------------------------
def _np_deconv(x, w, b, stride):
    c_in, c_out, k, _ = w.shape
    _, h_in, w_in = x.shape
    y = np.zeros((c_out, (h_in - 1) * stride + k, (w_in - 1) * stride + k), np.float32)
    for ci in range(c_in):
        for ih in range(h_in):
            for iw in range(w_in):
                y[:, ih * stride:ih * stride + k, iw * stride:iw * stride + k] += \
                    x[ci, ih, iw] * w[ci]
    return y + b[:, None, None]


def reference_decode(z, raw):
    """z: (1, 100) -> (1, 1, 28, 28)."""
    h = z @ raw["wc"].T + raw["bc"]
    y = _np_deconv(h.reshape(64, 1, 1), raw["w_d1"], raw["b_d1"], 2)
    y = np.maximum(y, 0.0)
    y = _np_deconv(y, raw["w_d2"], raw["b_d2"], 2)
    y = np.maximum(y, 0.0)
    y = _np_deconv(y, raw["w_d3"], raw["b_d3"], 2)
    return (1.0 / (1.0 + np.exp(-y)))[None]


if __name__ == "__main__":
    raw, packed = make_params()
    key = jax.random.PRNGKey(0)
    kx, kz, kb = jax.random.split(key, 3)

    # Module-faithful forward: x contributes only its batch size (pinned to 1).
    x = jax.random.normal(kx, (1, 1, 28, 28), dtype=jnp.float32)
    x_d, z = autoencoder_forward(x, kz, packed)
    x_d = jax.block_until_ready(x_d)
    np.testing.assert_allclose(np.asarray(x_d), reference_decode(np.asarray(z), raw),
                               rtol=3e-3, atol=3e-3)
    assert x_d.shape == (1, 1, 28, 28) and z.shape == (1, IMG_EMBEDDING_DIM)

    # Batched decoder path: grid over B, weights VMEM-resident across grid steps.
    zb = jax.random.uniform(kb, (4, IMG_EMBEDDING_DIM), dtype=jnp.float32)
    imgs = jax.block_until_ready(decode_latents(zb, packed))
    ref_b = np.concatenate([reference_decode(np.asarray(zb[i:i + 1]), raw)
                            for i in range(zb.shape[0])], axis=0)
    np.testing.assert_allclose(np.asarray(imgs), ref_b, rtol=3e-3, atol=3e-3)

    print("KERNEL_OK")
</pallas_src>

<mosaic_0001>
module attributes {stable_mosaic.version = 11 : i64} {
  func.func @kernel(%arg0: i32, %arg1: memref<1x1x100xf32, #tpu.memory_space<vmem>>, %arg2: memref<100x512xbf16, #tpu.memory_space<vmem>>, %arg3: memref<1x512xf32, #tpu.memory_space<vmem>>, %arg4: memref<128x1536xbf16, #tpu.memory_space<vmem>>, %arg5: memref<16x48xf32, #tpu.memory_space<vmem>>, %arg6: memref<1x192xf32, #tpu.memory_space<vmem>>, %arg7: memref<192x768xbf16, #tpu.memory_space<vmem>>, %arg8: memref<28x96xf32, #tpu.memory_space<vmem>>, %arg9: memref<1x28xf32, #tpu.memory_space<vmem>>, %arg10: memref<1x1x28x28xf32, #tpu.memory_space<vmem>>) attributes {dimension_semantics = [#tpu.dimension_semantics<parallel>], iteration_bounds = array<i64: 1>, scalar_prefetch = 0 : i64, scratch_operands = 0 : i64, tpu.core_type = #tpu.core_type<tc>, window_params = [{transform_indices = @transform_0, window_bounds = array<i64: 1, 1, 100>}, {pipeline_mode = #tpu.pipeline_mode<synchronous>, transform_indices = @transform_1, window_bounds = array<i64: 100, 512>}, {pipeline_mode = #tpu.pipeline_mode<synchronous>, transform_indices = @transform_2, window_bounds = array<i64: 1, 512>}, {pipeline_mode = #tpu.pipeline_mode<synchronous>, transform_indices = @transform_3, window_bounds = array<i64: 128, 1536>}, {pipeline_mode = #tpu.pipeline_mode<synchronous>, transform_indices = @transform_4, window_bounds = array<i64: 16, 48>}, {pipeline_mode = #tpu.pipeline_mode<synchronous>, transform_indices = @transform_5, window_bounds = array<i64: 1, 192>}, {pipeline_mode = #tpu.pipeline_mode<synchronous>, transform_indices = @transform_6, window_bounds = array<i64: 192, 768>}, {pipeline_mode = #tpu.pipeline_mode<synchronous>, transform_indices = @transform_7, window_bounds = array<i64: 28, 96>}, {pipeline_mode = #tpu.pipeline_mode<synchronous>, transform_indices = @transform_8, window_bounds = array<i64: 1, 28>}, {transform_indices = @transform_9, window_bounds = array<i64: 1, 1, 28, 28>}]} {
    %c0 = arith.constant 0 : index
    %c0_0 = arith.constant 0 : index
    %c0_1 = arith.constant 0 : index
    %0 = vector.load %arg1[%c0, %c0_0, %c0_1] : memref<1x1x100xf32, #tpu.memory_space<vmem>>, vector<1x1x100xf32>
    %1 = vector.shape_cast %0 : vector<1x1x100xf32> to vector<1x100xf32>
    %2 = arith.truncf %1 : vector<1x100xf32> to vector<1x100xbf16>
    %c0_2 = arith.constant 0 : index
    %c0_3 = arith.constant 0 : index
    %3 = vector.load %arg2[%c0_2, %c0_3] : memref<100x512xbf16, #tpu.memory_space<vmem>>, vector<100x512xbf16>
    %cst = arith.constant dense<0.000000e+00> : vector<1x512xf32>
    %4 = tpu.matmul %2, %3, %cst {dimension_numbers = #tpu.dot_dimension_numbers<[1], [0], [0], [1], [0, 0, 1, 1], [], []>} : vector<1x100xbf16>, vector<100x512xbf16>, vector<1x512xf32> -> vector<1x512xf32>
    %c0_4 = arith.constant 0 : index
    %c0_5 = arith.constant 0 : index
    %5 = vector.load %arg3[%c0_4, %c0_5] : memref<1x512xf32, #tpu.memory_space<vmem>>, vector<1x512xf32>
    %6 = arith.addf %4, %5 : vector<1x512xf32>
    %cst_6 = arith.constant 0.000000e+00 : f32
    %7 = vector.broadcast %cst_6 : f32 to vector<1x512xf32>
    %8 = arith.maximumf %6, %7 : vector<1x512xf32>
    %9 = tpu.iota {dimensions = array<i32: 0>} : vector<8x128xi32>
    %cst_7 = arith.constant 0.000000e+00 : f32
    %10 = vector.broadcast %cst_7 : f32 to vector<8x128xf32>
    %c0_i32 = arith.constant 0 : i32
    %11 = vector.broadcast %c0_i32 : i32 to vector<8x128xi32>
    %12 = arith.cmpi eq, %9, %11 : vector<8x128xi32>
    %13 = vector.extract_strided_slice %8 {offsets = [0, 0], sizes = [1, 128], strides = [1, 1]} : vector<1x512xf32> to vector<1x128xf32>
    %14 = vector.shape_cast %13 : vector<1x128xf32> to vector<1x128xf32>
    %15 = vector.broadcast %14 : vector<1x128xf32> to vector<8x128xf32>
    %16 = arith.select %12, %15, %10 : vector<8x128xi1>, vector<8x128xf32>
    %c1_i32 = arith.constant 1 : i32
    %17 = vector.broadcast %c1_i32 : i32 to vector<8x128xi32>
    %18 = arith.cmpi eq, %9, %17 : vector<8x128xi32>
    %19 = vector.extract_strided_slice %8 {offsets = [0, 128], sizes = [1, 128], strides = [1, 1]} : vector<1x512xf32> to vector<1x128xf32>
    %20 = vector.shape_cast %19 : vector<1x128xf32> to vector<1x128xf32>
    %21 = vector.broadcast %20 : vector<1x128xf32> to vector<8x128xf32>
    %22 = arith.select %18, %21, %16 : vector<8x128xi1>, vector<8x128xf32>
    %c2_i32 = arith.constant 2 : i32
    %23 = vector.broadcast %c2_i32 : i32 to vector<8x128xi32>
    %24 = arith.cmpi eq, %9, %23 : vector<8x128xi32>
    %25 = vector.extract_strided_slice %8 {offsets = [0, 256], sizes = [1, 128], strides = [1, 1]} : vector<1x512xf32> to vector<1x128xf32>
    %26 = vector.shape_cast %25 : vector<1x128xf32> to vector<1x128xf32>
    %27 = vector.broadcast %26 : vector<1x128xf32> to vector<8x128xf32>
    %28 = arith.select %24, %27, %22 : vector<8x128xi1>, vector<8x128xf32>
    %c3_i32 = arith.constant 3 : i32
    %29 = vector.broadcast %c3_i32 : i32 to vector<8x128xi32>
    %30 = arith.cmpi eq, %9, %29 : vector<8x128xi32>
    %31 = vector.extract_strided_slice %8 {offsets = [0, 384], sizes = [1, 128], strides = [1, 1]} : vector<1x512xf32> to vector<1x128xf32>
    %32 = vector.shape_cast %31 : vector<1x128xf32> to vector<1x128xf32>
    %33 = vector.broadcast %32 : vector<1x128xf32> to vector<8x128xf32>
    %34 = arith.select %30, %33, %28 : vector<8x128xi1>, vector<8x128xf32>
    %35 = arith.truncf %34 : vector<8x128xf32> to vector<8x128xbf16>
    %c0_8 = arith.constant 0 : index
    %c0_9 = arith.constant 0 : index
    %36 = vector.load %arg4[%c0_8, %c0_9] : memref<128x1536xbf16, #tpu.memory_space<vmem>>, vector<128x1536xbf16>
    %cst_10 = arith.constant dense<0.000000e+00> : vector<8x1536xf32>
    %37 = tpu.matmul %35, %36, %cst_10 {dimension_numbers = #tpu.dot_dimension_numbers<[1], [0], [0], [1], [0, 0, 1, 1], [], []>} : vector<8x128xbf16>, vector<128x1536xbf16>, vector<8x1536xf32> -> vector<8x1536xf32>
    %38 = vector.extract_strided_slice %37 {offsets = [0, 0], sizes = [8, 256], strides = [1, 1]} : vector<8x1536xf32> to vector<8x256xf32>
    %39 = vector.extract_strided_slice %37 {offsets = [0, 256], sizes = [8, 256], strides = [1, 1]} : vector<8x1536xf32> to vector<8x256xf32>
    %40 = vector.extract_strided_slice %37 {offsets = [0, 512], sizes = [8, 256], strides = [1, 1]} : vector<8x1536xf32> to vector<8x256xf32>
    %41 = vector.extract_strided_slice %37 {offsets = [0, 768], sizes = [8, 256], strides = [1, 1]} : vector<8x1536xf32> to vector<8x256xf32>
    %42 = vector.extract_strided_slice %37 {offsets = [0, 1024], sizes = [8, 256], strides = [1, 1]} : vector<8x1536xf32> to vector<8x256xf32>
    %43 = vector.extract_strided_slice %37 {offsets = [0, 1280], sizes = [8, 256], strides = [1, 1]} : vector<8x1536xf32> to vector<8x256xf32>
    %44 = tpu.concatenate %38, %39, %40, %41, %42, %43 in 0 : vector<8x256xf32>, vector<8x256xf32>, vector<8x256xf32>, vector<8x256xf32>, vector<8x256xf32>, vector<8x256xf32> -> vector<48x256xf32>
    %c0_11 = arith.constant 0 : index
    %c0_12 = arith.constant 0 : index
    %45 = vector.load %arg5[%c0_11, %c0_12] : memref<16x48xf32, #tpu.memory_space<vmem>>, vector<16x48xf32>
    %cst_13 = arith.constant dense<0.000000e+00> : vector<16x256xf32>
    %46 = tpu.matmul %45, %44, %cst_13 {dimension_numbers = #tpu.dot_dimension_numbers<[1], [0], [0], [1], [0, 0, 1, 1], [], []>} : vector<16x48xf32>, vector<48x256xf32>, vector<16x256xf32> -> vector<16x256xf32>
    %47 = vector.extract_strided_slice %46 {offsets = [0, 0], sizes = [16, 192], strides = [1, 1]} : vector<16x256xf32> to vector<16x192xf32>
    %c0_14 = arith.constant 0 : index
    %c0_15 = arith.constant 0 : index
    %48 = vector.load %arg6[%c0_14, %c0_15] : memref<1x192xf32, #tpu.memory_space<vmem>>, vector<1x192xf32>
    %49 = vector.broadcast %48 : vector<1x192xf32> to vector<16x192xf32>
    %50 = arith.addf %47, %49 : vector<16x192xf32>
    %cst_16 = arith.constant 0.000000e+00 : f32
    %51 = vector.broadcast %cst_16 : f32 to vector<16x192xf32>
    %52 = arith.maximumf %50, %51 : vector<16x192xf32>
    %53 = arith.truncf %52 : vector<16x192xf32> to vector<16x192xbf16>
    %c0_17 = arith.constant 0 : index
    %c0_18 = arith.constant 0 : index
    %54 = vector.load %arg7[%c0_17, %c0_18] : memref<192x768xbf16, #tpu.memory_space<vmem>>, vector<192x768xbf16>
    %cst_19 = arith.constant dense<0.000000e+00> : vector<16x768xf32>
    %55 = tpu.matmul %53, %54, %cst_19 {dimension_numbers = #tpu.dot_dimension_numbers<[1], [0], [0], [1], [0, 0, 1, 1], [], []>} : vector<16x192xbf16>, vector<192x768xbf16>, vector<16x768xf32> -> vector<16x768xf32>
    %56 = vector.extract_strided_slice %55 {offsets = [0, 0], sizes = [16, 128], strides = [1, 1]} : vector<16x768xf32> to vector<16x128xf32>
    %57 = vector.extract_strided_slice %55 {offsets = [0, 128], sizes = [16, 128], strides = [1, 1]} : vector<16x768xf32> to vector<16x128xf32>
    %58 = vector.extract_strided_slice %55 {offsets = [0, 256], sizes = [16, 128], strides = [1, 1]} : vector<16x768xf32> to vector<16x128xf32>
    %59 = vector.extract_strided_slice %55 {offsets = [0, 384], sizes = [16, 128], strides = [1, 1]} : vector<16x768xf32> to vector<16x128xf32>
    %60 = vector.extract_strided_slice %55 {offsets = [0, 512], sizes = [16, 128], strides = [1, 1]} : vector<16x768xf32> to vector<16x128xf32>
    %61 = vector.extract_strided_slice %55 {offsets = [0, 640], sizes = [16, 128], strides = [1, 1]} : vector<16x768xf32> to vector<16x128xf32>
    %62 = tpu.concatenate %56, %57, %58, %59, %60, %61 in 0 : vector<16x128xf32>, vector<16x128xf32>, vector<16x128xf32>, vector<16x128xf32>, vector<16x128xf32>, vector<16x128xf32> -> vector<96x128xf32>
    %c0_20 = arith.constant 0 : index
    %c0_21 = arith.constant 0 : index
    %63 = vector.load %arg8[%c0_20, %c0_21] : memref<28x96xf32, #tpu.memory_space<vmem>>, vector<28x96xf32>
    %cst_22 = arith.constant dense<0.000000e+00> : vector<28x128xf32>
    %64 = tpu.matmul %63, %62, %cst_22 {dimension_numbers = #tpu.dot_dimension_numbers<[1], [0], [0], [1], [0, 0, 1, 1], [], []>} : vector<28x96xf32>, vector<96x128xf32>, vector<28x128xf32> -> vector<28x128xf32>
    %65 = vector.extract_strided_slice %64 {offsets = [0, 0], sizes = [28, 28], strides = [1, 1]} : vector<28x128xf32> to vector<28x28xf32>
    %c0_23 = arith.constant 0 : index
    %c0_24 = arith.constant 0 : index
    %66 = vector.load %arg9[%c0_23, %c0_24] : memref<1x28xf32, #tpu.memory_space<vmem>>, vector<1x28xf32>
    %67 = vector.broadcast %66 : vector<1x28xf32> to vector<28x28xf32>
    %68 = arith.addf %65, %67 : vector<28x28xf32>
    %cst_25 = arith.constant 0.000000e+00 : f32
    %69 = vector.broadcast %cst_25 : f32 to vector<28x28xf32>
    %70 = arith.subf %69, %68 : vector<28x28xf32>
    %71 = math.exp %70 : vector<28x28xf32>
    %cst_26 = arith.constant 1.000000e+00 : f32
    %72 = vector.broadcast %cst_26 : f32 to vector<28x28xf32>
    %73 = arith.addf %72, %71 : vector<28x28xf32>
    %74 = tpu.reciprocal %73 {approx = true} : vector<28x28xf32> -> vector<28x28xf32>
    %c0_27 = arith.constant 0 : index
    %c0_28 = arith.constant 0 : index
    %c0_29 = arith.constant 0 : index
    %c0_30 = arith.constant 0 : index
    %75 = vector.load %arg10[%c0_27, %c0_28, %c0_29, %c0_30] : memref<1x1x28x28xf32, #tpu.memory_space<vmem>>, vector<1x1x28x28xf32>
    %76 = vector.shape_cast %75 : vector<1x1x28x28xf32> to vector<28x28xf32>
    %77 = vector.shape_cast %74 : vector<28x28xf32> to vector<1x1x28x28xf32>
    tpu.vector_store %arg10[%c0_27, %c0_28, %c0_29, %c0_30], %77 {strides = array<i32>} : memref<1x1x28x28xf32, #tpu.memory_space<vmem>>, vector<1x1x28x28xf32>,
    return
  }
  func.func @transform_0(%arg0: i32) -> (i32, i32, i32) {
    %c0_i32 = arith.constant 0 : i32
    %c0_i32_0 = arith.constant 0 : i32
    %c0_i32_1 = arith.constant 0 : i32
    return %arg0, %c0_i32, %c0_i32_0 : i32, i32, i32
  }
  func.func @transform_1(%arg0: i32) -> (i32, i32) {
    %c0_i32 = arith.constant 0 : i32
    %c0_i32_0 = arith.constant 0 : i32
    %c0_i32_1 = arith.constant 0 : i32
    return %c0_i32, %c0_i32_0 : i32, i32
  }
  func.func @transform_2(%arg0: i32) -> (i32, i32) {
    %c0_i32 = arith.constant 0 : i32
    %c0_i32_0 = arith.constant 0 : i32
    %c0_i32_1 = arith.constant 0 : i32
    return %c0_i32, %c0_i32_0 : i32, i32
  }
  func.func @transform_3(%arg0: i32) -> (i32, i32) {
    %c0_i32 = arith.constant 0 : i32
    %c0_i32_0 = arith.constant 0 : i32
    %c0_i32_1 = arith.constant 0 : i32
    return %c0_i32, %c0_i32_0 : i32, i32
  }
  func.func @transform_4(%arg0: i32) -> (i32, i32) {
    %c0_i32 = arith.constant 0 : i32
    %c0_i32_0 = arith.constant 0 : i32
    %c0_i32_1 = arith.constant 0 : i32
    return %c0_i32, %c0_i32_0 : i32, i32
  }
  func.func @transform_5(%arg0: i32) -> (i32, i32) {
    %c0_i32 = arith.constant 0 : i32
    %c0_i32_0 = arith.constant 0 : i32
    %c0_i32_1 = arith.constant 0 : i32
    return %c0_i32, %c0_i32_0 : i32, i32
  }
  func.func @transform_6(%arg0: i32) -> (i32, i32) {
    %c0_i32 = arith.constant 0 : i32
    %c0_i32_0 = arith.constant 0 : i32
    %c0_i32_1 = arith.constant 0 : i32
    return %c0_i32, %c0_i32_0 : i32, i32
  }
  func.func @transform_7(%arg0: i32) -> (i32, i32) {
    %c0_i32 = arith.constant 0 : i32
    %c0_i32_0 = arith.constant 0 : i32
    %c0_i32_1 = arith.constant 0 : i32
    return %c0_i32, %c0_i32_0 : i32, i32
  }
  func.func @transform_8(%arg0: i32) -> (i32, i32) {
    %c0_i32 = arith.constant 0 : i32
    %c0_i32_0 = arith.constant 0 : i32
    %c0_i32_1 = arith.constant 0 : i32
    return %c0_i32, %c0_i32_0 : i32, i32
  }
  func.func @transform_9(%arg0: i32) -> (i32, i32, i32, i32) {
    %c0_i32 = arith.constant 0 : i32
    %c0_i32_0 = arith.constant 0 : i32
    %c0_i32_1 = arith.constant 0 : i32
    %c0_i32_2 = arith.constant 0 : i32
    return %arg0, %c0_i32, %c0_i32_0, %c0_i32_1 : i32, i32, i32, i32
  }
}

</mosaic_0001>

<bundles_post_ra>
// kernel: tpu_custom_call.1
= control target key start
LH: loop header
LB: loop body
LE: loop exit
PB: predicated region body
PF: predicated region fallthrough
CT: control target
= control target key end

     0   :  { %14 = vsyncpa [#allocation3], 0  ;;  %s3037_s0 = inlined_call_operand.hbm [shape: f32[1,1,100], index: 0, kind: input, shape index: {}]   ;;  %s3038_s1 = inlined_call_operand.hbm [shape: bf16[100,512], index: 1, kind: input, shape index: {}]   ;;  %s3039_s2 = inlined_call_operand.vmem [shape: f32[1,512], index: 2, kind: input, shape index: {}]   ;;  %s3040_s3 = inlined_call_operand.hbm [shape: bf16[128,1536], index: 3, kind: input, shape index: {}]   ;;  %s3041_s4 = inlined_call_operand.hbm [shape: f32[16,48], index: 4, kind: input, shape index: {}]   ;;  %s3042_s5 = inlined_call_operand.vmem [shape: f32[1,192], index: 5, kind: input, shape index: {}]   ;;  %s3043_s6 = inlined_call_operand.hbm [shape: bf16[192,768], index: 6, kind: input, shape index: {}]   ;;  %s3044_s7 = inlined_call_operand.hbm [shape: f32[28,96], index: 7, kind: input, shape index: {}]   ;;  %s3045_s8 = inlined_call_operand.vmem [shape: f32[1,28], index: 8, kind: input, shape index: {}]   ;;  %s3046_s9 = inlined_call_operand.vmem [shape: f32[1,1,28,28], index: 9, kind: output, shape index: {}]  }
   0x1   :  { %15 = vsyncpa [#allocation5], 0 }
   0x2   :  { %16 = vsyncpa [#allocation8], 0 }
   0x3   :  { %17 = vsyncpa [#allocation11], 0  ;;  %s2821_s30 = smov [#allocation4]   ;;  %s2681_s13 = scalar_lea.hbm %s3038_s1, 3328 }
   0x4   :  { %s33_s10 = sshll.u32 %s2821_s30, 4  ;;  %p2682_p0 = scmp.ne.s32.totalorder %s3038_s1, %s2681_s13  ;;  %s34_s10 = int_to_ptr.vmem [resolvable:$true] %s33_s10 }
   0x5   :  { %p2685_p1 = scmp.lt.u32.totalorder %s2681_s13, %s3038_s1 }
   0x7   :  { %p2687_p2 = pnand %p2685_p1, %p2682_p0 }
   0x9   :  { %2690 = shalt.err (!%p2687_p2)
}
   0xa   :  { %s2691_s18 = scalar_lea.vmem %s34_s10, 3328  ;;  %p2696_p4 = scmp.lt.s32.totalorder %s34_s10, %s34_s10 }
   0xb   :  { %p2692_p3 = scmp.ne.s32.totalorder %s34_s10, %s2691_s18  ;;  %p2697_p5 = scmp.lt.s32.totalorder %s2691_s18, %s2691_s18 }
   0xd   :  { %p2698_p6 = por %p2697_p5, %p2696_p4 }
   0xf   :  { %p2699_p7 = pnand %p2698_p6, %p2692_p3 }
  0x11   :  { %2702 = shalt.err (!%p2699_p7)
}
  0x12   :  { %s2822_s19 = smov 256   ;;  %s2823_s20 = smov 16  }
  0x13   :  { %39 = dma.hbm_to_vmem [thread:$0]  %s3038_s1, 3328, %s34_s10, [#allocation5], %s2822_s19, %s2822_s19, %s2823_s20  }
  0x14   :  { %s2824_s23 = smov [#allocation7]   ;;  %s2703_s27 = scalar_lea.hbm %s3041_s4, 256 }
  0x15   :  { %s59_s24 = sshll.u32 %s2824_s23, 4  ;;  %p2704_p8 = scmp.ne.s32.totalorder %s3041_s4, %s2703_s27  ;;  %s60_s24 = int_to_ptr.vmem [resolvable:$true] %s59_s24 }
  0x16   :  { %p2707_p9 = scmp.lt.u32.totalorder %s2703_s27, %s3041_s4 }
  0x18   :  { %p2709_p10 = pnand %p2707_p9, %p2704_p8 }
  0x1a   :  { %2712 = shalt.err (!%p2709_p10)
}
  0x1b   :  { %s2713_s12 = scalar_lea.vmem %s60_s24, 256  ;;  %p2718_p12 = scmp.lt.s32.totalorder %s60_s24, %s60_s24 }
  0x1c   :  { %p2714_p11 = scmp.ne.s32.totalorder %s60_s24, %s2713_s12  ;;  %p2719_p13 = scmp.lt.s32.totalorder %s2713_s12, %s2713_s12 }
  0x1e   :  { %p2720_p0 = por %p2719_p13, %p2718_p12 }
  0x20   :  { %p2721_p1 = pnand %p2720_p0, %p2714_p11 }
  0x22   :  { %2724 = shalt.err (!%p2721_p1)
}
  0x23   :  { %s2825_s1 = smov 128   ;;  %s2826_s10 = smov 8  }
  0x24   :  { %65 = dma.hbm_to_vmem [thread:$0]  %s3041_s4, 256, %s60_s24, [#allocation8], %s2825_s1, %s2825_s1, %s2826_s10  }
  0x25   :  { %s2827_s15 = smov [#allocation2]   ;;  %s2828_s17 = smov [#allocation6]  }
  0x26   :  { %s24_s16 = sshll.u32 %s2827_s15, 4  ;;  %s47_s18 = sshll.u32 %s2828_s17, 4  ;;  %s25_s16 = int_to_ptr.vmem [resolvable:$true] %s24_s16  ;;  %s2914_s18 = int_to_ptr.vmem [resolvable:$true] %s47_s18 }
  0x27   :  { %s2725_s21 = scalar_lea.hbm %s3037_s0, 16 }
  0x28   :  { %p2726_p2 = scmp.ne.s32.totalorder %s3037_s0, %s2725_s21  ;;  %p2729_p3 = scmp.lt.u32.totalorder %s2725_s21, %s3037_s0 }
  0x2a   :  { %p2731_p4 = pnand %p2729_p3, %p2726_p2 }
  0x2c   :  { %2734 = shalt.err (!%p2731_p4)
}
  0x2d   :  { %s2735_s4 = scalar_lea.vmem %s25_s16, 16  ;;  %s2739_s24 = scalar_lea.vmem %s25_s16, 32 }
  0x2e   :  { %p2736_p5 = scmp.ne.s32.totalorder %s25_s16, %s2735_s4  ;;  %p2740_p6 = scmp.lt.s32.totalorder %s25_s16, %s25_s16 }
  0x2f   :  { %p2741_p7 = scmp.lt.s32.totalorder %s2739_s24, %s2735_s4 }
  0x31   :  { %p2742_p8 = por %p2741_p7, %p2740_p6 }
  0x33   :  { %p2743_p9 = pnand %p2742_p8, %p2736_p5 }
  0x35   :  { %2746 = shalt.err (!%p2743_p9)
}
  0x36   :  { %27 = dma.hbm_to_vmem [thread:$0]  %s3037_s0, 16, %s25_s16, [#allocation3]  }
  0x37   :  { %s2747_s11 = scalar_lea.hbm %s3040_s3, 12288 }
  0x38   :  { %p2748_p10 = scmp.ne.s32.totalorder %s3040_s3, %s2747_s11  ;;  %p2751_p11 = scmp.lt.u32.totalorder %s2747_s11, %s3040_s3 }
  0x3a   :  { %p2753_p12 = pnand %p2751_p11, %p2748_p10 }
  0x3c   :  { %2756 = shalt.err (!%p2753_p12)
}
  0x3d   :  { %s2757_s17 = scalar_lea.vmem %s2914_s18, 12288  ;;  %p2762_p0 = scmp.lt.s32.totalorder %s2914_s18, %s2914_s18 }
  0x3e   :  { %p2758_p13 = scmp.ne.s32.totalorder %s2914_s18, %s2757_s17  ;;  %p2763_p1 = scmp.lt.s32.totalorder %s2757_s17, %s2757_s17 }
  0x40   :  { %p2764_p2 = por %p2763_p1, %p2762_p0 }
  0x42   :  { %p2765_p3 = pnand %p2764_p2, %p2758_p13 }
  0x44   :  { %2768 = shalt.err (!%p2765_p3)
}
  0x45   :  { %s2829_s0 = smov 768   ;;  %s2830_s16 = smov 48  }
  0x46   :  { %53 = dma.hbm_to_vmem [thread:$0]  %s3040_s3, 12288, %s2914_s18, [#allocation5], %s2829_s0, %s2829_s0, %s2830_s16  }
  0x47   :  { %s2831_s21 = smov [#allocation9]   ;;  %s2769_s26 = scalar_lea.hbm %s3043_s6, 9216 }
  0x48   :  { %s73_s22 = sshll.u32 %s2831_s21, 4  ;;  %p2770_p4 = scmp.ne.s32.totalorder %s3043_s6, %s2769_s26  ;;  %s74_s22 = int_to_ptr.vmem [resolvable:$true] %s73_s22 }
  0x49   :  { %p2773_p5 = scmp.lt.u32.totalorder %s2769_s26, %s3043_s6 }
  0x4b   :  { %p2775_p6 = pnand %p2773_p5, %p2770_p4 }
  0x4d   :  { %2778 = shalt.err (!%p2775_p6)
}
  0x4e   :  { %s2779_s29 = scalar_lea.vmem %s74_s22, 9216  ;;  %p2784_p8 = scmp.lt.s32.totalorder %s74_s22, %s74_s22 }
  0x4f   :  { %p2780_p7 = scmp.ne.s32.totalorder %s74_s22, %s2779_s29  ;;  %p2785_p9 = scmp.lt.s32.totalorder %s2779_s29, %s2779_s29 }
  0x51   :  { %p2786_p10 = por %p2785_p9, %p2784_p8 }
  0x53   :  { %p2787_p11 = pnand %p2786_p10, %p2780_p7 }
  0x55   :  { %2790 = shalt.err (!%p2787_p11)
}
  0x56   :  { %s2832_s3 = smov 384   ;;  %s2833_s18 = smov 24  }
  0x57   :  { %79 = dma.hbm_to_vmem [thread:$0]  %s3043_s6, 9216, %s74_s22, [#allocation8], %s2832_s3, %s2832_s3, %s2833_s18  }
  0x58   :  { %s2834_s12 = smov [#allocation10]   ;;  %s2791_s17 = scalar_lea.hbm %s3044_s7, 512 }
  0x59   :  { %s85_s13 = sshll.u32 %s2834_s12, 4  ;;  %p2792_p12 = scmp.ne.s32.totalorder %s3044_s7, %s2791_s17  ;;  %s86_s13 = int_to_ptr.vmem [resolvable:$true] %s85_s13 }
  0x5a   :  { %p2795_p13 = scmp.lt.u32.totalorder %s2791_s17, %s3044_s7 }
  0x5c   :  { %p2797_p0 = pnand %p2795_p13, %p2792_p12 }
  0x5e   :  { %2800 = shalt.err (!%p2797_p0)
}
  0x5f   :  { %s2801_s21 = scalar_lea.vmem %s86_s13, 512  ;;  %p2806_p2 = scmp.lt.s32.totalorder %s86_s13, %s86_s13 }
  0x60   :  { %p2802_p1 = scmp.ne.s32.totalorder %s86_s13, %s2801_s21  ;;  %p2807_p3 = scmp.lt.s32.totalorder %s2801_s21, %s2801_s21 }
  0x62   :  { %p2808_p4 = por %p2807_p3, %p2806_p2 }
  0x64   :  { %p2809_p5 = pnand %p2808_p4, %p2802_p1 }
  0x66   :  { %2812 = shalt.err (!%p2809_p5)
}
  0x67   :  { %91 = dma.hbm_to_vmem [thread:$0]  %s3044_s7, 512, %s86_s13, [#allocation11], %s2825_s1, %s2825_s1, %s2826_s10  }
  0x68   :  { %2813 = dma.done.wait [#allocation3], 16  }
  0x69   :  { %2814 = vsyncadd [#allocation3], 4294967280 }
  0x6a   :  { %2815 = dma.done.wait [#allocation5], 15616  }
  0x6b   :  { %2816 = vsyncadd [#allocation5], 4294951680 }
  0x6c   :  { %2817 = dma.done.wait [#allocation8], 9472  }
  0x6d   :  { %2818 = vsyncadd [#allocation8], 4294957824 }
  0x6e   :  { %2819 = dma.done.wait [#allocation11], 512  }
  0x6f   :  { %2820 = vsyncadd [#allocation11], 4294966784  ;;  %v2835_v0 = vmov 0   ;;  %v2373_v1 = vld [vmem:[#allocation4 + $0x4] ss:$16 sps:$4 sm:$0xff]   ;;  %vm297_vm0 = vcmask 1041408  }
  0x70   :  { %342 = vmatprep.mubr.bf16.mxu0 %v2835_v0  ;;  %383 = vmatprep.mubr.bf16.mxu1 %v2835_v0  ;;  %v2375_v2 = vld [vmem:[#allocation4 + $0xc] ss:$16 sps:$4 sm:$0xff]   ;;  %v2377_v3 = vld [vmem:[#allocation4] ss:$16 sps:$4 sm:$0xff]   ;;  %v2378_v4 = vld [vmem:[#allocation4 + $0x8] ss:$16 sps:$4 sm:$0xff]  }
  0x71   :  { %310 = vmatprep.subr.bf16.mxu0 %v2373_v1  ;;  %351 = vmatprep.subr.bf16.mxu1 %v2375_v2  ;;  %v2379_v5 = vld [vmem:[#allocation4 + $0x24] ss:$16 sps:$4 sm:$0xff]   ;;  %v2381_v6 = vld [vmem:[#allocation4 + $0x2c] ss:$16 sps:$4 sm:$0xff]   ;;  %v2383_v7 = vld [vmem:[#allocation4 + $0x20] ss:$16 sps:$4 sm:$0xff]  }
  0x72   :  { %311 = vmatpush1.bf16.msra.mxu0 %v2377_v3  ;;  %352 = vmatpush1.bf16.msra.mxu1 %v2378_v4  ;;  %v2384_v8 = vld [vmem:[#allocation4 + $0x28] ss:$16 sps:$4 sm:$0xff]   ;;  %v2385_v9 = vld [vmem:[#allocation4 + $0x44] ss:$16 sps:$4 sm:$0xff]   ;;  %v2387_v10 = vld [vmem:[#allocation4 + $0x4c] ss:$16 sps:$4 sm:$0xff]  }
  0x73   :  { %312 = vmatprep.subr.bf16.mxu0 %v2379_v5  ;;  %353 = vmatprep.subr.bf16.mxu1 %v2381_v6  ;;  %v2389_v11 = vld [vmem:[#allocation4 + $0x40] ss:$16 sps:$4 sm:$0xff]   ;;  %v2390_v12 = vld [vmem:[#allocation4 + $0x48] ss:$16 sps:$4 sm:$0xff]   ;;  %v2391_v13 = vld [vmem:[#allocation4 + $0x64] ss:$16 sps:$4 sm:$0xff]   ;;  %v273_v6 = vlaneseq }
  0x74   :  { %v2393_v14 = vld [vmem:[#allocation4 + $0x6c] ss:$16 sps:$4 sm:$0xff]   ;;  %v2395_v15 = vld [vmem:[#allocation4 + $0x60] ss:$16 sps:$4 sm:$0xff]   ;;  %v2396_v16 = vld [vmem:[#allocation4 + $0x68] ss:$16 sps:$4 sm:$0xff]  }
  0x75   :  { %v2397_v17 = vld [vmem:[#allocation4 + $0x84] ss:$16 sps:$4 sm:$0xff]   ;;  %v2399_v18 = vld [vmem:[#allocation4 + $0x8c] ss:$16 sps:$4 sm:$0xff]   ;;  %v2401_v19 = vld [vmem:[#allocation4 + $0x80] ss:$16 sps:$4 sm:$0xff]  }
  0x76   :  { %313 = vmatpush1.bf16.msra.mxu0 %v2383_v7  ;;  %354 = vmatpush1.bf16.msra.mxu1 %v2384_v8  ;;  %v2402_v20 = vld [vmem:[#allocation4 + $0x88] ss:$16 sps:$4 sm:$0xff]   ;;  %v2403_v21 = vld [vmem:[#allocation4 + $0xa4] ss:$16 sps:$4 sm:$0xff]   ;;  %v2405_v22 = vld [vmem:[#allocation4 + $0xac] ss:$16 sps:$4 sm:$0xff]  }
  0x77   :  { %314 = vmatprep.subr.bf16.mxu0 %v2385_v9  ;;  %355 = vmatprep.subr.bf16.mxu1 %v2387_v10  ;;  %v139_v23 = vld [vmem:[#allocation4 + $0xc0] sm:$0x33]  ;;  %v140_v24 = vld [vmem:[#allocation4 + $0xc8] sm:$0x33]  ;;  %v113_v31 = vld [vmem:[#allocation2] sm:$0x1] }
  0x78   :  { %v2407_v25 = vld [vmem:[#allocation4 + $0xa0] ss:$16 sps:$4 sm:$0xff]   ;;  %v2408_v26 = vld [vmem:[#allocation4 + $0xa8] ss:$16 sps:$4 sm:$0xff]   ;;  %v2090_v27 = vcombine.high %v139_v23, %v139_v23  ;;  %v2092_v28 = vcombine.high %v140_v24, %v140_v24  ;;  %v2089_v29 = vcombine.low %v139_v23, %v139_v23  ;;  %v2091_v30 = vcombine.low %v140_v24, %v140_v24  ;;  %v2415_v32 = vld [vmem:[#allocation6 + $0x4] ss:$48 sps:$4 sm:$0xff]  }
  0x79   :  { %v2418_v35 = vld [vmem:[#allocation6 + $0xc] ss:$48 sps:$4 sm:$0xff]   ;;  %v114_v36 = vpack.c.bf16 %v113_v31, %v113_v31  ;;  %v2413_v37 = vld [vmem:[#allocation6] ss:$48 sps:$4 sm:$0xff]   ;;  %vm293_vm1 = vcmask 818176   ;;  %v2976_v7 = vshrl.u32 %v273_v6, 7 }
  0x7a   :  { %315 = vmatpush1.bf16.msra.mxu0 %v2389_v11  ;;  %356 = vmatpush1.bf16.msra.mxu1 %v2390_v12  ;;  %v299_v33 = vsel %vm297_vm0, %v2089_v29, 0  ;;  %v305_v34 = vsel %vm297_vm0, %v2091_v30, 0  ;;  %v2416_v38 = vld [vmem:[#allocation6 + $0x8] ss:$48 sps:$4 sm:$0xff]   ;;  %v2421_v39 = vld [vmem:[#allocation6 + $0x64] ss:$48 sps:$4 sm:$0xff]  }
  0x7b   :  { %316 = vmatprep.subr.bf16.mxu0 %v2391_v13  ;;  %357 = vmatprep.subr.bf16.mxu1 %v2393_v14  ;;  %v2424_v40 = vld [vmem:[#allocation6 + $0x6c] ss:$48 sps:$4 sm:$0xff]   ;;  %v2419_v41 = vld [vmem:[#allocation6 + $0x60] ss:$48 sps:$4 sm:$0xff]   ;;  %v2422_v42 = vld [vmem:[#allocation6 + $0x68] ss:$48 sps:$4 sm:$0xff]  }
  0x7c   :  { %v2427_v43 = vld [vmem:[#allocation6 + $0xc4] ss:$48 sps:$4 sm:$0xff]   ;;  %v2430_v44 = vld [vmem:[#allocation6 + $0xcc] ss:$48 sps:$4 sm:$0xff]   ;;  %v2425_v45 = vld [vmem:[#allocation6 + $0xc0] ss:$48 sps:$4 sm:$0xff]  }
  0x7d   :  { %v2428_v46 = vld [vmem:[#allocation6 + $0xc8] ss:$48 sps:$4 sm:$0xff]   ;;  %v2433_v47 = vld [vmem:[#allocation6 + $0x124] ss:$48 sps:$4 sm:$0xff]   ;;  %v2436_v48 = vld [vmem:[#allocation6 + $0x12c] ss:$48 sps:$4 sm:$0xff]  }
  0x7e   :  { %317 = vmatpush1.bf16.msra.mxu0 %v2395_v15  ;;  %358 = vmatpush1.bf16.msra.mxu1 %v2396_v16  ;;  %v2431_v49 = vld [vmem:[#allocation6 + $0x120] ss:$48 sps:$4 sm:$0xff]   ;;  %v2434_v50 = vld [vmem:[#allocation6 + $0x128] ss:$48 sps:$4 sm:$0xff]   ;;  %v2439_v51 = vld [vmem:[#allocation6 + $0x184] ss:$48 sps:$4 sm:$0xff]  }
  0x7f   :  { %318 = vmatprep.subr.bf16.mxu0 %v2397_v17  ;;  %359 = vmatprep.subr.bf16.mxu1 %v2399_v18  ;;  %v2442_v52 = vld [vmem:[#allocation6 + $0x18c] ss:$48 sps:$4 sm:$0xff]   ;;  %v2437_v53 = vld [vmem:[#allocation6 + $0x180] ss:$48 sps:$4 sm:$0xff]   ;;  %v2440_v54 = vld [vmem:[#allocation6 + $0x188] ss:$48 sps:$4 sm:$0xff]  }
  0x80   :  { %v2445_v55 = vld [vmem:[#allocation6 + $0x1e4] ss:$48 sps:$4 sm:$0xff]   ;;  %v2448_v56 = vld [vmem:[#allocation6 + $0x1ec] ss:$48 sps:$4 sm:$0xff]   ;;  %v2443_v57 = vld [vmem:[#allocation6 + $0x1e0] ss:$48 sps:$4 sm:$0xff]  }
  0x81   :  { %v2446_v58 = vld [vmem:[#allocation6 + $0x1e8] ss:$48 sps:$4 sm:$0xff]   ;;  %v2451_v59 = vld [vmem:[#allocation6 + $0x244] ss:$48 sps:$4 sm:$0xff]   ;;  %v2454_v60 = vld [vmem:[#allocation6 + $0x24c] ss:$48 sps:$4 sm:$0xff]  }
  0x82   :  { %319 = vmatpush1.bf16.msra.mxu0 %v2401_v19  ;;  %360 = vmatpush1.bf16.msra.mxu1 %v2402_v20  ;;  %v2449_v61 = vld [vmem:[#allocation6 + $0x240] ss:$48 sps:$4 sm:$0xff]   ;;  %v2452_v62 = vld [vmem:[#allocation6 + $0x248] ss:$48 sps:$4 sm:$0xff]   ;;  %v2457_v63 = vld [vmem:[#allocation6 + $0x2a4] ss:$48 sps:$4 sm:$0xff]  }
  0x83   :  { %320 = vmatprep.subr.bf16.mxu0 %v2403_v21  ;;  %361 = vmatprep.subr.bf16.mxu1 %v2405_v22  ;;  %v2460_v1 = vld [vmem:[#allocation6 + $0x2ac] ss:$48 sps:$4 sm:$0xff]   ;;  %v2455_v2 = vld [vmem:[#allocation6 + $0x2a0] ss:$48 sps:$4 sm:$0xff]   ;;  %v2458_v3 = vld [vmem:[#allocation6 + $0x2a8] ss:$48 sps:$4 sm:$0xff]  }
  0x84   :  { %v2463_v4 = vld [vmem:[#allocation6 + $0x14] ss:$48 sps:$4 sm:$0xff]   ;;  %v2466_v5 = vld [vmem:[#allocation6 + $0x1c] ss:$48 sps:$4 sm:$0xff]   ;;  %v2979_v8 = vsub.s32 0, %v2976_v7  ;;  %v283_v9 = vsub.s32 2, %v2976_v7 }
  0x85   :  { %v141_v10 = vld [vmem:[%s3039_s2] sm:$0xf]  ;;  %v279_v11 = vsub.s32 1, %v2976_v7  ;;  %v287_v12 = vsub.s32 3, %v2976_v7  ;;  %vm398_vm2 = vcmp.eq.s32.totalorder %v2976_v7, 0  ;;  %vm404_vm3 = vcmp.eq.s32.totalorder %v2976_v7, 1 }
  0x86   :  { %321 = vmatpush1.bf16.msra.mxu0 %v2407_v25  ;;  %362 = vmatpush1.bf16.msra.mxu1 %v2408_v26  ;;  %v276_v13 = vrot.slane %v141_v10, %v2979_v8  ;;  %v284_v14 = vrot.slane %v141_v10, %v283_v9  ;;  %vm410_vm4 = vcmp.eq.s32.totalorder %v2976_v7, 2  ;;  %vm416_vm5 = vcmp.eq.s32.totalorder %v2976_v7, 3  ;;  %v2508_v6 = vld [vmem:[#allocation6 + $0x2bc] ss:$48 sps:$4 sm:$0xff]   ;;  %v2503_v9 = vld [vmem:[#allocation6 + $0x2b0] ss:$48 sps:$4 sm:$0xff]  }
  0x87   :  { %2093 = vmatprep.subr.msk.bf16.mxu0 %vm297_vm0, %v2090_v27  ;;  %2095 = vmatprep.subr.msk.bf16.mxu1 %vm297_vm0, %v2092_v28  ;;  %v280_v15 = vrot.slane %v141_v10, %v279_v11  ;;  %v288_v16 = vrot.slane %v141_v10, %v287_v12  ;;  %v2506_v10 = vld [vmem:[#allocation6 + $0x2b8] ss:$48 sps:$4 sm:$0xff]   ;;  %v2511_v12 = vld [vmem:[#allocation6 + $0x24] ss:$48 sps:$4 sm:$0xff]   ;;  %vm1247_vm6 = vcmask 392192   ;;  %vm1785_vm7 = vcmask 523264  }
  0x88   :  { %v2632_v7 = vld [vmem:[#allocation9 + $0x40] ss:$24 sps:$4 sm:$0xff]   ;;  %vm1922_vm8 = vcmask 785408   ;;  %vm2051_vm9 = vcmask 228352   ;;  %vm2055_vm10 = vcmask 224256  }
  0x8a   :  { %323 = vmatpush1.bf16.msra.mxu0 %v299_v33  ;;  %364 = vmatpush1.bf16.msra.mxu1 %v305_v34 }
  0x8b   :  { %999 = vmatprep.subr.bf16.mxu0 %v2415_v32  ;;  %1040 = vmatprep.subr.bf16.mxu1 %v2418_v35 }
  0x8d   :  { %2094 = vmatmul.mubr.msk.bf16.vlgmr.msra.gmra.mrb[0].mxu0 %vm293_vm1, %v114_v36  ;;  %2096 = vmatmul.mubr.msk.bf16.vlgmr.msra.gmra.mrb[0].mxu1 %vm293_vm1, %v114_v36 }
  0x8e   :  { %1000 = vmatpush1.bf16.msra.mxu0 %v2413_v37  ;;  %1041 = vmatpush1.bf16.msra.mxu1 %v2416_v38 }
  0x8f   :  { %1001 = vmatprep.subr.bf16.mxu0 %v2421_v39  ;;  %1042 = vmatprep.subr.bf16.mxu1 %v2424_v40 }
  0x90   :  { %1031 = vmatprep.mubr.bf16.mxu0 %v2835_v0  ;;  %1072 = vmatprep.mubr.bf16.mxu1 %v2835_v0 }
  0x92   :  { %1002 = vmatpush1.bf16.msra.mxu0 %v2419_v41  ;;  %1043 = vmatpush1.bf16.msra.mxu1 %v2422_v42  ;;  %v2461_v41 = vld [vmem:[#allocation6 + $0x10] ss:$48 sps:$4 sm:$0xff]   ;;  %v2464_v42 = vld [vmem:[#allocation6 + $0x18] ss:$48 sps:$4 sm:$0xff]  }
  0x93   :  { %1003 = vmatprep.subr.bf16.mxu0 %v2427_v43  ;;  %1044 = vmatprep.subr.bf16.mxu1 %v2430_v44  ;;  %v2469_v44 = vld [vmem:[#allocation6 + $0x74] ss:$48 sps:$4 sm:$0xff]  }
  0x96   :  { %1004 = vmatpush1.bf16.msra.mxu0 %v2425_v45  ;;  %1045 = vmatpush1.bf16.msra.mxu1 %v2428_v46  ;;  %v2472_v45 = vld [vmem:[#allocation6 + $0x7c] ss:$48 sps:$4 sm:$0xff]   ;;  %v2467_v46 = vld [vmem:[#allocation6 + $0x70] ss:$48 sps:$4 sm:$0xff]  }
  0x97   :  { %1005 = vmatprep.subr.bf16.mxu0 %v2433_v47  ;;  %1046 = vmatprep.subr.bf16.mxu1 %v2436_v48  ;;  %v2470_v47 = vld [vmem:[#allocation6 + $0x78] ss:$48 sps:$4 sm:$0xff]   ;;  %v2475_v48 = vld [vmem:[#allocation6 + $0xd4] ss:$48 sps:$4 sm:$0xff]  }
  0x9a   :  { %1006 = vmatpush1.bf16.msra.mxu0 %v2431_v49  ;;  %1047 = vmatpush1.bf16.msra.mxu1 %v2434_v50  ;;  %v2478_v49 = vld [vmem:[#allocation6 + $0xdc] ss:$48 sps:$4 sm:$0xff]   ;;  %v2473_v50 = vld [vmem:[#allocation6 + $0xd0] ss:$48 sps:$4 sm:$0xff]  }
  0x9b   :  { %1007 = vmatprep.subr.bf16.mxu0 %v2439_v51  ;;  %1048 = vmatprep.subr.bf16.mxu1 %v2442_v52  ;;  %v2476_v51 = vld [vmem:[#allocation6 + $0xd8] ss:$48 sps:$4 sm:$0xff]   ;;  %v2481_v52 = vld [vmem:[#allocation6 + $0x134] ss:$48 sps:$4 sm:$0xff]  }
  0x9e   :  { %1008 = vmatpush1.bf16.msra.mxu0 %v2437_v53  ;;  %1049 = vmatpush1.bf16.msra.mxu1 %v2440_v54  ;;  %v2484_v53 = vld [vmem:[#allocation6 + $0x13c] ss:$48 sps:$4 sm:$0xff]   ;;  %v2479_v54 = vld [vmem:[#allocation6 + $0x130] ss:$48 sps:$4 sm:$0xff]  }
  0x9f   :  { %1009 = vmatprep.subr.bf16.mxu0 %v2445_v55  ;;  %1050 = vmatprep.subr.bf16.mxu1 %v2448_v56  ;;  %v2482_v55 = vld [vmem:[#allocation6 + $0x138] ss:$48 sps:$4 sm:$0xff]   ;;  %v2487_v56 = vld [vmem:[#allocation6 + $0x194] ss:$48 sps:$4 sm:$0xff]  }
  0xa2   :  { %1010 = vmatpush1.bf16.msra.mxu0 %v2443_v57  ;;  %1051 = vmatpush1.bf16.msra.mxu1 %v2446_v58  ;;  %v2490_v57 = vld [vmem:[#allocation6 + $0x19c] ss:$48 sps:$4 sm:$0xff]   ;;  %v2485_v58 = vld [vmem:[#allocation6 + $0x190] ss:$48 sps:$4 sm:$0xff]  }
  0xa3   :  { %1011 = vmatprep.subr.bf16.mxu0 %v2451_v59  ;;  %1052 = vmatprep.subr.bf16.mxu1 %v2454_v60  ;;  %v2488_v59 = vld [vmem:[#allocation6 + $0x198] ss:$48 sps:$4 sm:$0xff]   ;;  %v2493_v60 = vld [vmem:[#allocation6 + $0x1f4] ss:$48 sps:$4 sm:$0xff]  }
  0xa6   :  { %1012 = vmatpush1.bf16.msra.mxu0 %v2449_v61  ;;  %1053 = vmatpush1.bf16.msra.mxu1 %v2452_v62  ;;  %v2496_v61 = vld [vmem:[#allocation6 + $0x1fc] ss:$48 sps:$4 sm:$0xff]   ;;  %v2491_v62 = vld [vmem:[#allocation6 + $0x1f0] ss:$48 sps:$4 sm:$0xff]  }
  0xa7   :  { %1013 = vmatprep.subr.bf16.mxu0 %v2457_v63  ;;  %1054 = vmatprep.subr.bf16.mxu1 %v2460_v1  ;;  %v2494_v63 = vld [vmem:[#allocation6 + $0x1f8] ss:$48 sps:$4 sm:$0xff]   ;;  %v2499_v1 = vld [vmem:[#allocation6 + $0x254] ss:$48 sps:$4 sm:$0xff]  }
  0xaa   :  { %1014 = vmatpush1.bf16.msra.mxu0 %v2455_v2  ;;  %1055 = vmatpush1.bf16.msra.mxu1 %v2458_v3  ;;  %v2502_v2 = vld [vmem:[#allocation6 + $0x25c] ss:$48 sps:$4 sm:$0xff]   ;;  %v2497_v3 = vld [vmem:[#allocation6 + $0x250] ss:$48 sps:$4 sm:$0xff]  }
  0xab   :  { %1081 = vmatprep.subr.bf16.mxu0 %v2463_v4  ;;  %1122 = vmatprep.subr.bf16.mxu1 %v2466_v5  ;;  %v2500_v4 = vld [vmem:[#allocation6 + $0x258] ss:$48 sps:$4 sm:$0xff]   ;;  %v2505_v5 = vld [vmem:[#allocation6 + $0x2b4] ss:$48 sps:$4 sm:$0xff]  }
 0x160   :  { %v344_v17 = vpop.f32.mrb[0].mxu0  ;;  %v385_v18 = vpop.f32.mrb[0].mxu1 }
 0x161   :  { %v345_v19 = vadd.f32 %v344_v17, %v276_v13  ;;  %v386_v20 = vadd.f32 %v385_v18, %v284_v14  ;;  %v346_v21 = vpop.f32.mrb[1].mxu0  ;;  %v387_v22 = vpop.f32.mrb[1].mxu1  ;;  %v2514_v13 = vld [vmem:[#allocation6 + $0x2c] ss:$48 sps:$4 sm:$0xff]   ;;  %v2509_v14 = vld [vmem:[#allocation6 + $0x20] ss:$48 sps:$4 sm:$0xff]  }
 0x162   :  { %v347_v23 = vadd.f32 %v346_v21, %v280_v15  ;;  %v388_v24 = vadd.f32 %v387_v22, %v288_v16  ;;  %v348_v25 = vpop.f32.mrb[2].mxu0  ;;  %v389_v26 = vpop.f32.mrb[2].mxu1  ;;  %v2512_v15 = vld [vmem:[#allocation6 + $0x28] ss:$48 sps:$4 sm:$0xff]   ;;  %v2517_v16 = vld [vmem:[#allocation6 + $0x84] ss:$48 sps:$4 sm:$0xff]  }
 0x163   :  { %v392_v27 = vmax.f32 %v345_v19, 0.0  ;;  %v394_v28 = vmax.f32 %v386_v20, 0.0  ;;  %v349_v29 = vpop.f32.mrb[3].mxu0  ;;  %v390_v30 = vpop.f32.mrb[3].mxu1  ;;  %v2520_v17 = vld [vmem:[#allocation6 + $0x8c] ss:$48 sps:$4 sm:$0xff]  }
 0x164   :  { %v393_v31 = vmax.f32 %v347_v23, 0.0  ;;  %v395_v32 = vmax.f32 %v388_v24, 0.0  ;;  %v2515_v18 = vld [vmem:[#allocation6 + $0x80] ss:$48 sps:$4 sm:$0xff]   ;;  %v2518_v19 = vld [vmem:[#allocation6 + $0x88] ss:$48 sps:$4 sm:$0xff]  }
 0x165   :  { %v402_v33 = vrot.slane %v392_v27, %v2979_v8  ;;  %v414_v34 = vrot.slane %v394_v28, %v2979_v8  ;;  %v2523_v20 = vld [vmem:[#allocation6 + $0xe4] ss:$48 sps:$4 sm:$0xff]   ;;  %v2526_v21 = vld [vmem:[#allocation6 + $0xec] ss:$48 sps:$4 sm:$0xff]   ;;  %v2521_v22 = vld [vmem:[#allocation6 + $0xe0] ss:$48 sps:$4 sm:$0xff]  }
 0x166   :  { %v408_v35 = vrot.slane %v393_v31, %v2979_v8  ;;  %v420_v36 = vrot.slane %v395_v32, %v2979_v8  ;;  %v2524_v23 = vld [vmem:[#allocation6 + $0xe8] ss:$48 sps:$4 sm:$0xff]   ;;  %v2529_v24 = vld [vmem:[#allocation6 + $0x144] ss:$48 sps:$4 sm:$0xff]   ;;  %v2532_v25 = vld [vmem:[#allocation6 + $0x14c] ss:$48 sps:$4 sm:$0xff]  }
 0x167   :  { %v403_v37 = vsel %vm398_vm2, %v402_v33, 0.0  ;;  %v2527_v26 = vld [vmem:[#allocation6 + $0x140] ss:$48 sps:$4 sm:$0xff]   ;;  %v2530_v27 = vld [vmem:[#allocation6 + $0x148] ss:$48 sps:$4 sm:$0xff]  }
 0x168   :  { %v409_v38 = vsel %vm404_vm3, %v408_v35, %v403_v37  ;;  %v2535_v28 = vld [vmem:[#allocation6 + $0x1a4] ss:$48 sps:$4 sm:$0xff]   ;;  %v2538_v29 = vld [vmem:[#allocation6 + $0x1ac] ss:$48 sps:$4 sm:$0xff]   ;;  %v2533_v30 = vld [vmem:[#allocation6 + $0x1a0] ss:$48 sps:$4 sm:$0xff]  }
 0x169   :  { %v415_v39 = vsel %vm410_vm4, %v414_v34, %v409_v38  ;;  %v2541_v31 = vld [vmem:[#allocation6 + $0x204] ss:$48 sps:$4 sm:$0xff]   ;;  %v2544_v32 = vld [vmem:[#allocation6 + $0x20c] ss:$48 sps:$4 sm:$0xff]   ;;  %v2539_v33 = vld [vmem:[#allocation6 + $0x200] ss:$48 sps:$4 sm:$0xff]  }
 0x16a   :  { %v421_v40 = vsel %vm416_vm5, %v420_v36, %v415_v39  ;;  %v2542_v34 = vld [vmem:[#allocation6 + $0x208] ss:$48 sps:$4 sm:$0xff]   ;;  %v2547_v35 = vld [vmem:[#allocation6 + $0x264] ss:$48 sps:$4 sm:$0xff]   ;;  %v2550_v36 = vld [vmem:[#allocation6 + $0x26c] ss:$48 sps:$4 sm:$0xff]  }
 0x16b   :  { %v2998_v43 = vpack.c.bf16 %v421_v40, %v421_v40  ;;  %v2545_v37 = vld [vmem:[#allocation6 + $0x260] ss:$48 sps:$4 sm:$0xff]   ;;  %v2548_v38 = vld [vmem:[#allocation6 + $0x268] ss:$48 sps:$4 sm:$0xff]   ;;  %v2553_v39 = vld [vmem:[#allocation6 + $0x2c4] ss:$48 sps:$4 sm:$0xff]  }
 0x16c   :  { %v2556_v40 = vld [vmem:[#allocation6 + $0x2cc] ss:$48 sps:$4 sm:$0xff]  }
 0x16d   :  { %1032 = vmatmul.mubr.bf16.vlgmr.msra.gmra.mrb[4].mxu0 %v2998_v43  ;;  %1073 = vmatmul.mubr.bf16.vlgmr.msra.gmra.mrb[4].mxu1 %v2998_v43 }
 0x16e   :  { %1082 = vmatpush1.bf16.msra.mxu0 %v2461_v41  ;;  %1123 = vmatpush1.bf16.msra.mxu1 %v2464_v42  ;;  %v2551_v41 = vld [vmem:[#allocation6 + $0x2c0] ss:$48 sps:$4 sm:$0xff]   ;;  %v2554_v42 = vld [vmem:[#allocation6 + $0x2c8] ss:$48 sps:$4 sm:$0xff]  }
 0x16f   :  { %1083 = vmatprep.subr.bf16.mxu0 %v2469_v44  ;;  %1124 = vmatprep.subr.bf16.mxu1 %v2472_v45  ;;  %v2836_v44 = vmov 0.0   ;;  %v2557_v45 = vld [vmem:[#allocation9] ss:$24 sps:$4 sm:$0xff]  }
 0x170   :  { %1113 = vmatprep.mubr.bf16.mxu0 %v2835_v0  ;;  %1154 = vmatprep.mubr.bf16.mxu1 %v2835_v0 }
 0x172   :  { %1084 = vmatpush1.bf16.msra.mxu0 %v2467_v46  ;;  %1125 = vmatpush1.bf16.msra.mxu1 %v2470_v47  ;;  %v2559_v46 = vld [vmem:[#allocation9 + $0x4] ss:$24 sps:$4 sm:$0xff]   ;;  %v2565_v47 = vld [vmem:[#allocation9 + $0x34] ss:$24 sps:$4 sm:$0xff]  }
 0x173   :  { %1085 = vmatprep.subr.bf16.mxu0 %v2475_v48  ;;  %1126 = vmatprep.subr.bf16.mxu1 %v2478_v49  ;;  %v2563_v48 = vld [vmem:[#allocation9 + $0x30] ss:$24 sps:$4 sm:$0xff]   ;;  %v2571_v49 = vld [vmem:[#allocation9 + $0x64] ss:$24 sps:$4 sm:$0xff]  }
 0x176   :  { %1086 = vmatpush1.bf16.msra.mxu0 %v2473_v50  ;;  %1127 = vmatpush1.bf16.msra.mxu1 %v2476_v51  ;;  %v2569_v50 = vld [vmem:[#allocation9 + $0x60] ss:$24 sps:$4 sm:$0xff]   ;;  %v2577_v51 = vld [vmem:[#allocation9 + $0x94] ss:$24 sps:$4 sm:$0xff]  }
 0x177   :  { %1087 = vmatprep.subr.bf16.mxu0 %v2481_v52  ;;  %1128 = vmatprep.subr.bf16.mxu1 %v2484_v53  ;;  %v2575_v52 = vld [vmem:[#allocation9 + $0x90] ss:$24 sps:$4 sm:$0xff]   ;;  %v2583_v53 = vld [vmem:[#allocation9 + $0xc4] ss:$24 sps:$4 sm:$0xff]  }
 0x17a   :  { %1088 = vmatpush1.bf16.msra.mxu0 %v2479_v54  ;;  %1129 = vmatpush1.bf16.msra.mxu1 %v2482_v55  ;;  %v2589_v54 = vld [vmem:[#allocation9 + $0xf4] ss:$24 sps:$4 sm:$0xff]   ;;  %v2587_v55 = vld [vmem:[#allocation9 + $0xf0] ss:$24 sps:$4 sm:$0xff]  }
 0x17b   :  { %1089 = vmatprep.subr.bf16.mxu0 %v2487_v56  ;;  %1130 = vmatprep.subr.bf16.mxu1 %v2490_v57  ;;  %v2595_v56 = vld [vmem:[#allocation9 + $0x124] ss:$24 sps:$4 sm:$0xff]   ;;  %v2593_v57 = vld [vmem:[#allocation9 + $0x120] ss:$24 sps:$4 sm:$0xff]  }
 0x17e   :  { %1090 = vmatpush1.bf16.msra.mxu0 %v2485_v58  ;;  %1131 = vmatpush1.bf16.msra.mxu1 %v2488_v59  ;;  %v2601_v58 = vld [vmem:[#allocation9 + $0x154] ss:$24 sps:$4 sm:$0xff]   ;;  %v2599_v59 = vld [vmem:[#allocation9 + $0x150] ss:$24 sps:$4 sm:$0xff]  }
 0x17f   :  { %1091 = vmatprep.subr.bf16.mxu0 %v2493_v60  ;;  %1132 = vmatprep.subr.bf16.mxu1 %v2496_v61  ;;  %v2607_v60 = vld [vmem:[#allocation9 + $0x184] ss:$24 sps:$4 sm:$0xff]   ;;  %v2605_v61 = vld [vmem:[#allocation9 + $0x180] ss:$24 sps:$4 sm:$0xff]  }
 0x182   :  { %1092 = vmatpush1.bf16.msra.mxu0 %v2491_v62  ;;  %1133 = vmatpush1.bf16.msra.mxu1 %v2494_v63 }
 0x183   :  { %1093 = vmatprep.subr.bf16.mxu0 %v2499_v1  ;;  %1134 = vmatprep.subr.bf16.mxu1 %v2502_v2 }
 0x186   :  { %1094 = vmatpush1.bf16.msra.mxu0 %v2497_v3  ;;  %1135 = vmatpush1.bf16.msra.mxu1 %v2500_v4 }
 0x187   :  { %1095 = vmatprep.subr.bf16.mxu0 %v2505_v5  ;;  %1136 = vmatprep.subr.bf16.mxu1 %v2508_v6 }
 0x18a   :  { %1096 = vmatpush1.bf16.msra.mxu0 %v2503_v9  ;;  %1137 = vmatpush1.bf16.msra.mxu1 %v2506_v10 }
 0x18b   :  { %1163 = vmatprep.subr.bf16.mxu0 %v2511_v12  ;;  %1204 = vmatprep.subr.bf16.mxu1 %v2514_v13 }
 0x18d   :  { %1114 = vmatmul.mubr.bf16.vlgmr.msra.gmra.mrb[8].mxu0 %v2998_v43  ;;  %1155 = vmatmul.mubr.bf16.vlgmr.msra.gmra.mrb[8].mxu1 %v2998_v43 }
 0x18e   :  { %1164 = vmatpush1.bf16.msra.mxu0 %v2509_v14  ;;  %1205 = vmatpush1.bf16.msra.mxu1 %v2512_v15 }
 0x18f   :  { %1165 = vmatprep.subr.bf16.mxu0 %v2517_v16  ;;  %1206 = vmatprep.subr.bf16.mxu1 %v2520_v17 }
 0x190   :  { %1195 = vmatprep.mubr.bf16.mxu0 %v2835_v0  ;;  %1236 = vmatprep.mubr.bf16.mxu1 %v2835_v0  ;;  %v2536_v0 = vld [vmem:[#allocation6 + $0x1a8] ss:$48 sps:$4 sm:$0xff]  }
 0x192   :  { %1166 = vmatpush1.bf16.msra.mxu0 %v2515_v18  ;;  %1207 = vmatpush1.bf16.msra.mxu1 %v2518_v19 }
 0x193   :  { %1167 = vmatprep.subr.bf16.mxu0 %v2523_v20  ;;  %1208 = vmatprep.subr.bf16.mxu1 %v2526_v21 }
 0x196   :  { %1168 = vmatpush1.bf16.msra.mxu0 %v2521_v22  ;;  %1209 = vmatpush1.bf16.msra.mxu1 %v2524_v23 }
 0x197   :  { %1169 = vmatprep.subr.bf16.mxu0 %v2529_v24  ;;  %1210 = vmatprep.subr.bf16.mxu1 %v2532_v25 }
 0x19a   :  { %1170 = vmatpush1.bf16.msra.mxu0 %v2527_v26  ;;  %1211 = vmatpush1.bf16.msra.mxu1 %v2530_v27 }
 0x19b   :  { %1171 = vmatprep.subr.bf16.mxu0 %v2535_v28  ;;  %1212 = vmatprep.subr.bf16.mxu1 %v2538_v29 }
 0x19e   :  { %1172 = vmatpush1.bf16.msra.mxu0 %v2533_v30  ;;  %1213 = vmatpush1.bf16.msra.mxu1 %v2536_v0  ;;  %v2562_v30 = vld [vmem:[#allocation9 + $0xc] ss:$24 sps:$4 sm:$0xff]  }
 0x19f   :  { %1173 = vmatprep.subr.bf16.mxu0 %v2541_v31  ;;  %1214 = vmatprep.subr.bf16.mxu1 %v2544_v32  ;;  %v1245_v32 = vld [vmem:[#allocation7] sm:$0xff] }
 0x1a2   :  { %1174 = vmatpush1.bf16.msra.mxu0 %v2539_v33  ;;  %1215 = vmatpush1.bf16.msra.mxu1 %v2542_v34  ;;  %v2560_v33 = vld [vmem:[#allocation9 + $0x8] ss:$24 sps:$4 sm:$0xff]   ;;  %v2568_v34 = vld [vmem:[#allocation9 + $0x3c] ss:$24 sps:$4 sm:$0xff]  }
 0x1a3   :  { %1175 = vmatprep.subr.bf16.mxu0 %v2547_v35  ;;  %1216 = vmatprep.subr.bf16.mxu1 %v2550_v36  ;;  %v1246_v35 = vld [vmem:[#allocation7 + $0x8] sm:$0xff] }
 0x1a4   :  { %v2566_v36 = vld [vmem:[#allocation9 + $0x38] ss:$24 sps:$4 sm:$0xff]  }
 0x1a6   :  { %1176 = vmatpush1.bf16.msra.mxu0 %v2545_v37  ;;  %1217 = vmatpush1.bf16.msra.mxu1 %v2548_v38  ;;  %v2574_v37 = vld [vmem:[#allocation9 + $0x6c] ss:$24 sps:$4 sm:$0xff]   ;;  %v2572_v38 = vld [vmem:[#allocation9 + $0x68] ss:$24 sps:$4 sm:$0xff]  }
 0x1a7   :  { %1177 = vmatprep.subr.bf16.mxu0 %v2553_v39  ;;  %1218 = vmatprep.subr.bf16.mxu1 %v2556_v40  ;;  %v2580_v39 = vld [vmem:[#allocation9 + $0x9c] ss:$24 sps:$4 sm:$0xff]   ;;  %v2578_v40 = vld [vmem:[#allocation9 + $0x98] ss:$24 sps:$4 sm:$0xff]  }
 0x1aa   :  { %1178 = vmatpush1.bf16.msra.mxu0 %v2551_v41  ;;  %1219 = vmatpush1.bf16.msra.mxu1 %v2554_v42  ;;  %v2586_v41 = vld [vmem:[#allocation9 + $0xcc] ss:$24 sps:$4 sm:$0xff]   ;;  %v2584_v42 = vld [vmem:[#allocation9 + $0xc8] ss:$24 sps:$4 sm:$0xff]  }
 0x1ab   :  { %1789 = vmatprep.subr.bf16.mxu1 %v2559_v46  ;;  %v2598_v46 = vld [vmem:[#allocation9 + $0x12c] ss:$24 sps:$4 sm:$0xff]  }
 0x1ad   :  { %1196 = vmatmul.mubr.bf16.vlgmr.msra.gmra.mrb[12].mxu0 %v2998_v43  ;;  %1237 = vmatmul.mubr.bf16.vlgmr.msra.gmra.mrb[12].mxu1 %v2998_v43  ;;  %v2581_v43 = vld [vmem:[#allocation9 + $0xc0] ss:$24 sps:$4 sm:$0xff]  }
 0x1ae   :  { %1318 = vmatprep.mubr.f32.mxu0 %v2836_v44  ;;  %1790 = vmatpush1.bf16.msra.mxu1 %v2557_v45  ;;  %v2592_v45 = vld [vmem:[#allocation9 + $0xfc] ss:$24 sps:$4 sm:$0xff]  }
 0x1af   :  { %1791 = vmatprep.subr.bf16.mxu1 %v2565_v47  ;;  %v2596_v47 = vld [vmem:[#allocation9 + $0x128] ss:$24 sps:$4 sm:$0xff]  }
 0x1b2   :  { %1792 = vmatpush1.bf16.msra.mxu1 %v2563_v48  ;;  %v2604_v48 = vld [vmem:[#allocation9 + $0x15c] ss:$24 sps:$4 sm:$0xff]  }
 0x1b3   :  { %1793 = vmatprep.subr.bf16.mxu1 %v2571_v49  ;;  %v2602_v49 = vld [vmem:[#allocation9 + $0x158] ss:$24 sps:$4 sm:$0xff]  }
 0x1b6   :  { %1794 = vmatpush1.bf16.msra.mxu1 %v2569_v50  ;;  %v2610_v50 = vld [vmem:[#allocation9 + $0x18c] ss:$24 sps:$4 sm:$0xff]  }
 0x1b7   :  { %1795 = vmatprep.subr.bf16.mxu1 %v2577_v51  ;;  %v2608_v51 = vld [vmem:[#allocation9 + $0x188] ss:$24 sps:$4 sm:$0xff]  }
 0x1ba   :  { %1796 = vmatpush1.bf16.msra.mxu1 %v2575_v52  ;;  %v2613_v52 = vld [vmem:[#allocation9 + $0x1b4] ss:$24 sps:$4 sm:$0xff]  }
 0x1bb   :  { %1797 = vmatprep.subr.bf16.mxu1 %v2583_v53  ;;  %v2611_v53 = vld [vmem:[#allocation9 + $0x1b0] ss:$24 sps:$4 sm:$0xff]  }
 0x1be   :  { %1798 = vmatpush1.bf16.msra.mxu1 %v2581_v43  ;;  %v2616_v43 = vld [vmem:[#allocation9 + $0x1bc] ss:$24 sps:$4 sm:$0xff]  }
 0x1bf   :  { %1799 = vmatprep.subr.bf16.mxu1 %v2589_v54  ;;  %v2614_v54 = vld [vmem:[#allocation9 + $0x1b8] ss:$24 sps:$4 sm:$0xff]  }
 0x1c2   :  { %1800 = vmatpush1.bf16.msra.mxu1 %v2587_v55  ;;  %v2619_v55 = vld [vmem:[#allocation9 + $0x1e4] ss:$24 sps:$4 sm:$0xff]  }
 0x1c3   :  { %1801 = vmatprep.subr.bf16.mxu1 %v2595_v56  ;;  %v2617_v56 = vld [vmem:[#allocation9 + $0x1e0] ss:$24 sps:$4 sm:$0xff]  }
 0x1c6   :  { %1802 = vmatpush1.bf16.msra.mxu1 %v2593_v57  ;;  %v2622_v57 = vld [vmem:[#allocation9 + $0x1ec] ss:$24 sps:$4 sm:$0xff]  }
 0x1c7   :  { %1803 = vmatprep.subr.bf16.mxu1 %v2601_v58  ;;  %v2620_v58 = vld [vmem:[#allocation9 + $0x1e8] ss:$24 sps:$4 sm:$0xff]  }
 0x1ca   :  { %1804 = vmatpush1.bf16.msra.mxu1 %v2599_v59  ;;  %v2625_v59 = vld [vmem:[#allocation9 + $0x214] ss:$24 sps:$4 sm:$0xff]  }
 0x1cb   :  { %1805 = vmatprep.subr.bf16.mxu1 %v2607_v60  ;;  %v2623_v60 = vld [vmem:[#allocation9 + $0x210] ss:$24 sps:$4 sm:$0xff]  }
 0x1ce   :  { %1806 = vmatpush1.bf16.msra.mxu1 %v2605_v61  ;;  %v2628_v61 = vld [vmem:[#allocation9 + $0x21c] ss:$24 sps:$4 sm:$0xff]  }
 0x1cf   :  { %1807 = vmatprep.subr.bf16.mxu1 %v2613_v52 }
 0x1d2   :  { %1808 = vmatpush1.bf16.msra.mxu1 %v2611_v53 }
 0x1d3   :  { %1809 = vmatprep.subr.bf16.mxu1 %v2619_v55 }
 0x1d6   :  { %1810 = vmatpush1.bf16.msra.mxu1 %v2617_v56 }
 0x1d7   :  { %1811 = vmatprep.subr.bf16.mxu1 %v2625_v59  ;;  %v1919_v59 = vld [vmem:[#allocation10 + $0x8] sm:$0xff] }
 0x1da   :  { %1812 = vmatpush1.bf16.msra.mxu1 %v2623_v60  ;;  %v1920_v60 = vld [vmem:[#allocation10 + $0x10] sm:$0xff] }
 0x240   :  { %v1033_v62 = vpop.f32.mrb[4].mxu0  ;;  %v1074_v63 = vpop.f32.mrb[4].mxu1 }
 0x241   :  { %v2323_v1 = vpack.c.bf16 %v1074_v63, %v1033_v62  ;;  %v1035_v2 = vpop.f32.mrb[5].mxu0  ;;  %v1076_v3 = vpop.f32.mrb[5].mxu1  ;;  %v2626_v62 = vld [vmem:[#allocation9 + $0x218] ss:$24 sps:$4 sm:$0xff]   ;;  %v2631_v63 = vld [vmem:[#allocation9 + $0x14] ss:$24 sps:$4 sm:$0xff]  }
 0x242   :  { %v2321_v4 = vpack.c.bf16 %v1076_v3, %v1035_v2  ;;  %v1037_v5 = vpop.f32.mrb[6].mxu0  ;;  %v1078_v6 = vpop.f32.mrb[6].mxu1  ;;  %1875 = vmatprep.subr.bf16.mxu1 %v2631_v63 }
 0x243   :  { %v1038_v9 = vpop.f32.mrb[7].mxu0  ;;  %v1079_v10 = vpop.f32.mrb[7].mxu1 }
 0x244   :  { %2322 = vmatprep.subr.bf16.mxu0 %v2321_v4 }
 0x245   :  { %2324 = vmatpush1.bf16.msra.mxu0 %v2323_v1  ;;  %v1331_v1 = vld [vmem:[%s3042_s5] sm:$0x3] }
 0x246   :  { %v1336_v2 = vrot.slane %v1331_v1, %v2979_v8  ;;  %v1340_v4 = vrot.slane %v1331_v1, %v279_v11  ;;  %v2634_v8 = vld [vmem:[#allocation9 + $0x44] ss:$24 sps:$4 sm:$0xff]   ;;  %v2637_v11 = vld [vmem:[#allocation9 + $0x74] ss:$24 sps:$4 sm:$0xff]  }
 0x260   :  { %v1115_v12 = vpop.f32.mrb[8].mxu0  ;;  %v1156_v13 = vpop.f32.mrb[8].mxu1 }
 0x261   :  { %v2327_v14 = vpack.c.bf16 %v1156_v13, %v1115_v12  ;;  %v1117_v15 = vpop.f32.mrb[9].mxu0  ;;  %v1158_v16 = vpop.f32.mrb[9].mxu1 }
 0x262   :  { %v2325_v17 = vpack.c.bf16 %v1158_v16, %v1117_v15  ;;  %v1119_v18 = vpop.f32.mrb[10].mxu0  ;;  %v1160_v19 = vpop.f32.mrb[10].mxu1 }
 0x263   :  { %v1120_v20 = vpop.f32.mrb[11].mxu0  ;;  %v1161_v21 = vpop.f32.mrb[11].mxu1 }
 0x264   :  { %2326 = vmatprep.subr.bf16.mxu0 %v2325_v17  ;;  %v2629_v21 = vld [vmem:[#allocation9 + $0x10] ss:$24 sps:$4 sm:$0xff]  }
 0x265   :  { %2328 = vmatpush1.bf16.msra.mxu0 %v2327_v14 }
 0x280   :  { %v1197_v22 = vpop.f32.mrb[12].mxu0  ;;  %v1238_v23 = vpop.f32.mrb[12].mxu1 }
 0x281   :  { %v2331_v24 = vpack.c.bf16 %v1238_v23, %v1197_v22  ;;  %v1199_v25 = vpop.f32.mrb[13].mxu0  ;;  %v1240_v26 = vpop.f32.mrb[13].mxu1  ;;  %v2635_v22 = vld [vmem:[#allocation9 + $0x70] ss:$24 sps:$4 sm:$0xff]   ;;  %v2640_v23 = vld [vmem:[#allocation9 + $0xa4] ss:$24 sps:$4 sm:$0xff]  }
 0x282   :  { %v2329_v27 = vpack.c.bf16 %v1240_v26, %v1199_v25  ;;  %v1201_v28 = vpop.f32.mrb[14].mxu0  ;;  %v1242_v29 = vpop.f32.mrb[14].mxu1  ;;  %v2643_v25 = vld [vmem:[#allocation9 + $0xd4] ss:$24 sps:$4 sm:$0xff]   ;;  %v2641_v26 = vld [vmem:[#allocation9 + $0xd0] ss:$24 sps:$4 sm:$0xff]  }
 0x283   :  { %v1202_v0 = vpop.f32.mrb[15].mxu0  ;;  %v1243_v31 = vpop.f32.mrb[15].mxu1  ;;  %v2644_v28 = vld [vmem:[#allocation9 + $0x100] ss:$24 sps:$4 sm:$0xff]   ;;  %v2649_v29 = vld [vmem:[#allocation9 + $0x134] ss:$24 sps:$4 sm:$0xff]  }
 0x284   :  { %2330 = vmatprep.subr.bf16.mxu0 %v2329_v27  ;;  %v2646_v27 = vld [vmem:[#allocation9 + $0x104] ss:$24 sps:$4 sm:$0xff]   ;;  %v2650_v31 = vld [vmem:[#allocation9 + $0x160] ss:$24 sps:$4 sm:$0xff]  }
 0x285   :  { %2332 = vmatpush1.bf16.msra.mxu0 %v2331_v24  ;;  %v2638_v24 = vld [vmem:[#allocation9 + $0xa0] ss:$24 sps:$4 sm:$0xff]   ;;  %v2652_v0 = vld [vmem:[#allocation9 + $0x164] ss:$24 sps:$4 sm:$0xff]  }
 0x286   :  { %1832 = vmatprep.subr.bf16.mxu0 %v2562_v30  ;;  %v2647_v30 = vld [vmem:[#allocation9 + $0x130] ss:$24 sps:$4 sm:$0xff]  }
 0x288   :  { %2193 = vmatmul.mubr.msk.f32.vlgmr.msra.gmra.mrb[16].mxu0 %vm1247_vm6, %v1245_v32  ;;  %v2655_v32 = vld [vmem:[#allocation9 + $0x194] ss:$24 sps:$4 sm:$0xff]  }
 0x289   :  { %1324 = vmatprep.mubr.f32.mxu0 %v2836_v44  ;;  %1833 = vmatpush1.bf16.msra.mxu0 %v2560_v33  ;;  %v2590_v44 = vld [vmem:[#allocation9 + $0xf8] ss:$24 sps:$4 sm:$0xff]  }
 0x28a   :  { %1834 = vmatprep.subr.bf16.mxu0 %v2568_v34  ;;  %v2653_v33 = vld [vmem:[#allocation9 + $0x190] ss:$24 sps:$4 sm:$0xff]   ;;  %v2658_v34 = vld [vmem:[#allocation9 + $0x1c4] ss:$24 sps:$4 sm:$0xff]  }
 0x28c   :  { %2194 = vmatmul.mubr.msk.f32.gmra.mrb[18].mxu0 %vm1247_vm6, %v1246_v35  ;;  %v2656_v35 = vld [vmem:[#allocation9 + $0x1c0] ss:$24 sps:$4 sm:$0xff]  }
 0x28d   :  { %1835 = vmatpush1.bf16.msra.mxu0 %v2566_v36  ;;  %v2661_v36 = vld [vmem:[#allocation9 + $0x1f4] ss:$24 sps:$4 sm:$0xff]  }
 0x28e   :  { %1836 = vmatprep.subr.bf16.mxu0 %v2574_v37  ;;  %v2659_v37 = vld [vmem:[#allocation9 + $0x1f0] ss:$24 sps:$4 sm:$0xff]  }
 0x291   :  { %1837 = vmatpush1.bf16.msra.mxu0 %v2572_v38  ;;  %v2664_v38 = vld [vmem:[#allocation9 + $0x224] ss:$24 sps:$4 sm:$0xff]  }
 0x292   :  { %1838 = vmatprep.subr.bf16.mxu0 %v2580_v39  ;;  %v2662_v39 = vld [vmem:[#allocation9 + $0x220] ss:$24 sps:$4 sm:$0xff]  }
 0x295   :  { %1839 = vmatpush1.bf16.msra.mxu0 %v2578_v40  ;;  %v1918_v40 = vld [vmem:[#allocation10] sm:$0xff] }
 0x296   :  { %1840 = vmatprep.subr.bf16.mxu0 %v2586_v41 }
 0x299   :  { %1841 = vmatpush1.bf16.msra.mxu0 %v2584_v42 }
 0x29a   :  { %1842 = vmatprep.subr.bf16.mxu0 %v2592_v45 }
 0x29d   :  { %1843 = vmatpush1.bf16.msra.mxu0 %v2590_v44 }
 0x29e   :  { %1844 = vmatprep.subr.bf16.mxu0 %v2598_v46 }
 0x2a1   :  { %1845 = vmatpush1.bf16.msra.mxu0 %v2596_v47 }
 0x2a2   :  { %1846 = vmatprep.subr.bf16.mxu0 %v2604_v48 }
 0x2a5   :  { %1847 = vmatpush1.bf16.msra.mxu0 %v2602_v49 }
 0x2a6   :  { %1848 = vmatprep.subr.bf16.mxu0 %v2610_v50 }
 0x2a9   :  { %1849 = vmatpush1.bf16.msra.mxu0 %v2608_v51 }
 0x2aa   :  { %1850 = vmatprep.subr.bf16.mxu0 %v2616_v43 }
 0x2ad   :  { %1851 = vmatpush1.bf16.msra.mxu0 %v2614_v54 }
 0x2ae   :  { %1852 = vmatprep.subr.bf16.mxu0 %v2622_v57 }
 0x2b1   :  { %1853 = vmatpush1.bf16.msra.mxu0 %v2620_v58 }
 0x2b2   :  { %1854 = vmatprep.subr.bf16.mxu0 %v2628_v61  ;;  %v1921_v61 = vld [vmem:[#allocation10 + $0x18] sm:$0xf] }
 0x2b5   :  { %1855 = vmatpush1.bf16.msra.mxu0 %v2626_v62  ;;  %v2274_v62 = vld [vmem:[%s3045_s8] ss:$0 sm:$0xff] }
 0x35b   :  { %v1320_v3 = vpop.f32.mrb[16].mxu0 }
 0x35c   :  { %v1322_v5 = vpop.f32.mrb[17].mxu0  ;;  %v1343_v6 = vadd.f32 %v1336_v2, %v1320_v3 }
 0x35d   :  { %v1344_v9 = vadd.f32 %v1340_v4, %v1322_v5 }
 0x35e   :  { %v1347_v15 = vmax.f32 %v1343_v6, 0.0 }
 0x35f   :  { %v1326_v10 = vpop.f32.mrb[18].mxu0  ;;  %v1348_v17 = vmax.f32 %v1344_v9, 0.0 }
 0x360   :  { %v1345_v12 = vadd.f32 %v1336_v2, %v1326_v10  ;;  %v1328_v13 = vpop.f32.mrb[19].mxu0 }
 0x361   :  { %v1346_v14 = vadd.f32 %v1340_v4, %v1328_v13 }
 0x362   :  { %v1349_v16 = vmax.f32 %v1345_v12, 0.0 }
 0x363   :  { %v1350_v18 = vmax.f32 %v1346_v14, 0.0 }
 0x364   :  { %v1351_v19 = vpack.c.bf16 %v1349_v16, %v1347_v15 }
 0x365   :  { %v1352_v20 = vpack.c.bf16 %v1350_v18, %v1348_v17 }
 0x367   :  { %2267 = vmatprep.mubr.msk.bf16.mxu1 %vm1785_vm7, %v1352_v20  ;;  %2268 = vmatprep.mubr.msk.bf16.mxu0 %vm1785_vm7, %v1352_v20 }
 0x368   :  { %1822 = vmatmul.mubr.bf16.vlgmr.msra.gmra.mrb[16].mxu1 %v1351_v19  ;;  %1865 = vmatmul.mubr.bf16.vlgmr.msra.gmra.mrb[20].mxu0 %v1351_v19 }
 0x369   :  { %1876 = vmatpush1.bf16.msra.mxu1 %v2629_v21  ;;  %2269 = vmatprep.mubr.msk.bf16.mxu1 %vm1785_vm7, %v1352_v20 }
 0x36a   :  { %1877 = vmatprep.subr.bf16.mxu1 %v2634_v8  ;;  %2315 = vmatprep.mubr.msk.f32.mxu0 %vm1922_vm8, %v1918_v40 }
 0x36d   :  { %1878 = vmatpush1.bf16.msra.mxu1 %v2632_v7 }
 0x36e   :  { %1879 = vmatprep.subr.bf16.mxu1 %v2637_v11 }
 0x371   :  { %1880 = vmatpush1.bf16.msra.mxu1 %v2635_v22 }
 0x372   :  { %1881 = vmatprep.subr.bf16.mxu1 %v2640_v23 }
 0x375   :  { %1882 = vmatpush1.bf16.msra.mxu1 %v2638_v24 }
 0x376   :  { %1883 = vmatprep.subr.bf16.mxu1 %v2643_v25 }
 0x379   :  { %1884 = vmatpush1.bf16.msra.mxu1 %v2641_v26 }
 0x37a   :  { %1885 = vmatprep.subr.bf16.mxu1 %v2646_v27 }
 0x37d   :  { %1886 = vmatpush1.bf16.msra.mxu1 %v2644_v28 }
 0x37e   :  { %1887 = vmatprep.subr.bf16.mxu1 %v2649_v29 }
 0x381   :  { %1888 = vmatpush1.bf16.msra.mxu1 %v2647_v30 }
 0x382   :  { %1889 = vmatprep.subr.bf16.mxu1 %v2652_v0 }
 0x385   :  { %1890 = vmatpush1.bf16.msra.mxu1 %v2650_v31 }
 0x386   :  { %1891 = vmatprep.subr.bf16.mxu1 %v2655_v32 }
 0x389   :  { %1892 = vmatpush1.bf16.msra.mxu1 %v2653_v33 }
 0x38a   :  { %1893 = vmatprep.subr.bf16.mxu1 %v2658_v34 }
 0x38d   :  { %1894 = vmatpush1.bf16.msra.mxu1 %v2656_v35 }
 0x38e   :  { %1895 = vmatprep.subr.bf16.mxu1 %v2661_v36 }
 0x391   :  { %1896 = vmatpush1.bf16.msra.mxu1 %v2659_v37 }
 0x392   :  { %1897 = vmatprep.subr.bf16.mxu1 %v2664_v38 }
 0x395   :  { %1898 = vmatpush1.bf16.msra.mxu1 %v2662_v39 }
 0x398   :  { %1908 = vmatmul.mubr.bf16.vlgmr.msra.gmra.mrb[20].mxu1 %v1351_v19 }
 0x43b   :  { %v1823_v41 = vpop.f32.mrb[16].mxu1  ;;  %v1866_v42 = vpop.f32.mrb[20].mxu0 }
 0x43c   :  { %v1825_v45 = vpop.f32.mrb[17].mxu1  ;;  %v1868_v44 = vpop.f32.mrb[21].mxu0 }
 0x43d   :  { %v1827_v46 = vpop.f32.mrb[18].mxu1  ;;  %v1870_v47 = vpop.f32.mrb[22].mxu0 }
 0x43e   :  { %v2333_v48 = vpack.c.bf16 %v1827_v46, %v1823_v41  ;;  %v2341_v49 = vpack.c.bf16 %v1870_v47, %v1866_v42  ;;  %v1829_v50 = vpop.f32.mrb[19].mxu1  ;;  %v1872_v51 = vpop.f32.mrb[23].mxu0 }
 0x43f   :  { %v2337_v52 = vpack.c.bf16 %v1829_v50, %v1825_v45  ;;  %v2345_v53 = vpack.c.bf16 %v1872_v51, %v1868_v44 }
 0x440   :  { %2334 = vmatprep.subr.bf16.mxu0 %v2333_v48 }
 0x441   :  { %2336 = vmatpush3.bf16.msra.mxu0 %v2333_v48 }
 0x442   :  { %2338 = vmatprep.subr.bf16.mxu0 %v2337_v52 }
 0x445   :  { %2340 = vmatpush3.bf16.msra.mxu0 %v2337_v52 }
 0x446   :  { %2342 = vmatprep.subr.bf16.mxu0 %v2341_v49 }
 0x449   :  { %2344 = vmatpush3.bf16.msra.mxu0 %v2341_v49 }
 0x44a   :  { %2346 = vmatprep.subr.bf16.mxu0 %v2345_v53 }
 0x44d   :  { %2348 = vmatpush3.bf16.msra.mxu0 %v2345_v53 }
 0x46b   :  { %v1909_v43 = vpop.f32.mrb[20].mxu1 }
 0x46c   :  { %v1911_v54 = vpop.f32.mrb[21].mxu1 }
 0x46d   :  { %v1913_v55 = vpop.f32.mrb[22].mxu1 }
 0x46e   :  { %v2349_v56 = vpack.c.bf16 %v1913_v55, %v1909_v43  ;;  %v1915_v57 = vpop.f32.mrb[23].mxu1 }
 0x46f   :  { %v2353_v58 = vpack.c.bf16 %v1915_v57, %v1911_v54 }
 0x470   :  { %2350 = vmatprep.subr.bf16.mxu0 %v2349_v56 }
 0x471   :  { %2352 = vmatpush3.bf16.msra.mxu0 %v2349_v56 }
 0x472   :  { %2354 = vmatprep.subr.bf16.mxu0 %v2353_v58 }
 0x475   :  { %2356 = vmatpush3.bf16.msra.mxu0 %v2353_v58 }
 0x478   :  { %2316 = vmatmul.mubr.msk.f32.vlgmr.msra.gmra.mrb[24].mxu0 %vm1922_vm8, %v1919_v59 }
 0x479   :  { %2318 = vmatprep.mubr.msk.f32.mxu0 %vm1922_vm8, %v1920_v60 }
 0x47c   :  { %2319 = vmatmul.mubr.msk.f32.gmra.mrb[26].mxu0 %vm1922_vm8, %v1921_v61 }
 0x54b   :  { %v2317_v63 = vpop.f32.mrb[24].mxu0 }
 0x54c   :  { %v2028_v1 = vadd.f32 %v2317_v63, %v2274_v62  ;;  %v2001_v2 = vpop.f32.mrb[25].mxu0 }
 0x54d   :  { %v2027_v3 = vadd.f32 %v2274_v62, %v2001_v2 }
 0x54e   :  { %v2032_v4 = vsub.f32 0.0, %v2028_v1 }
 0x54f   :  { %v2031_v5 = vsub.f32 0.0, %v2027_v3  ;;  %v2320_v6 = vpop.f32.mrb[26].mxu0 }
 0x550   :  { %v2037_v9 = vmul.f32 1.442695, %v2032_v4  ;;  %v2030_v10 = vadd.f32 %v2320_v6, %v2274_v62  ;;  %v2011_v12 = vpop.f32.mrb[27].mxu0 }
 0x551   :  { %v2035_v13 = vmul.f32 1.442695, %v2031_v5  ;;  %v2029_v14 = vadd.f32 %v2274_v62, %v2011_v12 }
 0x552   :  { %2665 = vpow2.f32 %v2037_v9  ;;  %v2034_v15 = vsub.f32 0.0, %v2030_v10 }
 0x553   :  { %2667 = vpow2.f32 %v2035_v13  ;;  %v2033_v16 = vsub.f32 0.0, %v2029_v14 }
 0x554   :  { %v2041_v17 = vmul.f32 1.442695, %v2034_v15 }
 0x555   :  { %v2039_v18 = vmul.f32 1.442695, %v2033_v16 }
 0x556   :  { %2669 = vpow2.f32 %v2041_v17 }
 0x557   :  { %2671 = vpow2.f32 %v2039_v18 }
 0x55c   :  { %v2666_v19 = vpop.eup %2665 }
 0x55d   :  { %v2668_v20 = vpop.eup %2667  ;;  %v2044_v21 = vadd.f32 1.0, %v2666_v19 }
 0x55e   :  { %v2043_v8 = vadd.f32 1.0, %v2668_v20 }
 0x55f   :  { %2673 = vrcp.f32 %v2044_v21 }
 0x560   :  { %v2670_v7 = vpop.eup %2669  ;;  %2675 = vrcp.f32 %v2043_v8 }
 0x561   :  { %v2672_v11 = vpop.eup %2671  ;;  %v2046_v22 = vadd.f32 1.0, %v2670_v7 }
 0x562   :  { %v2045_v23 = vadd.f32 1.0, %v2672_v11 }
 0x563   :  { %2677 = vrcp.f32 %v2046_v22 }
 0x564   :  { %2679 = vrcp.f32 %v2045_v23 }
 0x569   :  { %v2674_v24 = vpop.eup %2673 }
 0x56a   :  { %v2676_v25 = vpop.eup %2675  ;;  %2053 = vst.msk [vmem:[%s3046_s9 + $0x8] sm:$0xff] %vm2051_vm9, %v2674_v24 }
 0x56b   :  { %2052 = vst.msk [vmem:[%s3046_s9] sm:$0xff] %vm2051_vm9, %v2676_v25 }
 0x56d   :  { %v2678_v26 = vpop.eup %2677 }
 0x56e   :  { %v2680_v27 = vpop.eup %2679  ;;  %2056 = vst.msk [vmem:[%s3046_s9 + $0x18] sm:$0xf] %vm2055_vm10, %v2678_v26 }
 0x56f   :  { %2054 = vst.msk [vmem:[%s3046_s9 + $0x10] sm:$0xff] %vm2051_vm9, %v2680_v27 }
 0x570   :  { %2061 = vsyncpa [#allocation3], 1 }
 0x571   :  { %2062 = vsyncpa [#allocation5], 1 }
 0x572   :  { %2063 = vsyncpa [#allocation8], 1 }
 0x573   :  { %2064 = vsyncpa [#allocation11], 1 }

</bundles_post_ra>
